<compile_context>
chip_gen: v6e
topology: v6e:2x2x1
jax: 0.10.0
libtpu: 0.0.40
codegen_flags: <defaults>
</compile_context>

<pallas_src>
import math

import jax
import jax.numpy as jnp
from jax.experimental import pallas as pl
from jax.experimental.pallas import tpu as pltpu

# ------------------------- synthetic RoBERTa config -------------------------
VOCAB = 100
HIDDEN = 32
LAYERS = 2
HEADS = 4
HEAD_DIM = HIDDEN // HEADS
INTER = 64
MAX_POS = 64
PAD_IDX = 1          # RoBERTa padding_idx
LN_EPS = 1e-5
NEG_INF = -1e9


# ------------------------------- fused kernel -------------------------------
def _encoder_kernel(emb_ref, mask_ref, embln_ref,
                    wqkv_ref, bqkv_ref, wo_ref, vecs_ref,
                    w1_ref, b1_ref, w2_ref,
                    o_ref):
    """Whole RoBERTa encoder for the whole batch, emitting only [CLS].

    emb_ref  : (B, S, H)   embedding sum (pre-LN)
    mask_ref : (B, 1, S)   attention_mask as float (1 = keep)
    embln_ref: (2, H)      embedding LayerNorm [gamma; beta]
    wqkv_ref : (L, H, 3H)  fused QKV weights
    bqkv_ref : (L, 1, 3H)
    wo_ref   : (L, H, H)
    vecs_ref : (L, 6, H)   [bo, ln1_g, ln1_b, b2, ln2_g, ln2_b]
    w1_ref   : (L, H, INTER);  b1_ref: (L, 1, INTER);  w2_ref: (L, INTER, H)
    o_ref    : (B, H)      [CLS] hidden state
    """
    B, S, H = emb_ref.shape
    BS = B * S
    scale = 1.0 / math.sqrt(HEAD_DIM)

    def layer_norm(v, g, b):
        mean = jnp.mean(v, axis=-1, keepdims=True)
        var = jnp.mean((v - mean) ** 2, axis=-1, keepdims=True)
        return (v - mean) * jax.lax.rsqrt(var + LN_EPS) * g + b

    # Embedding LayerNorm (no residual path).
    embln = embln_ref[...]
    x = emb_ref[...].astype(jnp.float32).reshape(BS, H)
    x = layer_norm(x, embln[0:1], embln[1:2])

    # Additive attention mask built in-kernel from the 0/1 mask: (B, 1, S).
    mask_add = (1.0 - mask_ref[...].astype(jnp.float32)) * NEG_INF

    for l in range(LAYERS):                       # static unroll over layers
        vecs = vecs_ref[l]                        # (6, H)

        # ---- fused QKV: one lane-dense matmul (BS, H) @ (H, 3H) ----
        qkv = jnp.dot(x, wqkv_ref[l],
                      preferred_element_type=jnp.float32) + bqkv_ref[l]
        qkv = qkv.reshape(B, S, 3 * H)
        q = qkv[:, :, 0:H]
        k = qkv[:, :, H:2 * H]
        v = qkv[:, :, 2 * H:3 * H]

        # ---- attention: per-head static loop, each einsum batched over B ----
        ctx_heads = []
        for h in range(HEADS):
            sl = slice(h * HEAD_DIM, (h + 1) * HEAD_DIM)
            qh, kh, vh = q[:, :, sl], k[:, :, sl], v[:, :, sl]
            sc = jnp.einsum("bqd,bkd->bqk", qh, kh,
                            preferred_element_type=jnp.float32) * scale
            sc = sc + mask_add                    # (B,S,S) + (B,1,S)
            m = jnp.max(sc, axis=-1, keepdims=True)
            p = jnp.exp(sc - m)
            p = p / jnp.sum(p, axis=-1, keepdims=True)      # exact softmax
            ctx_heads.append(jnp.einsum("bqk,bkd->bqd", p, vh,
                                        preferred_element_type=jnp.float32))
        ctx = jnp.concatenate(ctx_heads, axis=-1).reshape(BS, H)

        # ---- output projection (wo unsplit) + residual + LayerNorm ----
        attn = jnp.dot(ctx, wo_ref[l],
                       preferred_element_type=jnp.float32) + vecs[0:1]
        x = layer_norm(attn + x, vecs[1:2], vecs[2:3])

        # ---- FFN: matmul + exact (erf) GELU + matmul + residual + LN ----
        h1 = jnp.dot(x, w1_ref[l],
                     preferred_element_type=jnp.float32) + b1_ref[l]
        h1 = 0.5 * h1 * (1.0 + jax.lax.erf(h1 * (1.0 / math.sqrt(2.0))))
        ff = jnp.dot(h1, w2_ref[l],
                     preferred_element_type=jnp.float32) + vecs[3:4]
        x = layer_norm(ff + x, vecs[4:5], vecs[5:6])

    # ---- emit only the [CLS] rows: (B, H) ----
    o_ref[...] = x.reshape(B, S, H)[:, 0, :].astype(o_ref.dtype)


# ------------------------------ kernel wrapper -------------------------------
def _full_spec(shape):
    nd = len(shape)
    return pl.BlockSpec(shape, lambda i, _nd=nd: (0,) * _nd)


def pallas_roberta_encoder(emb, mask_f, weights):
    """emb: (B,S,H) f32; mask_f: (B,1,S) f32; weights: tuple of packed arrays.

    Returns the [CLS] hidden state, shape (B, H).
    """
    B, S, H = emb.shape
    inputs = (emb, mask_f) + tuple(weights)
    in_specs = [_full_spec(a.shape) for a in inputs]

    return pl.pallas_call(
        _encoder_kernel,
        out_shape=jax.ShapeDtypeStruct((B, H), jnp.float32),
        grid=(1,),                                 # whole batch in ONE step
        in_specs=in_specs,
        out_specs=pl.BlockSpec((B, H), lambda i: (0, 0)),
        compiler_params=pltpu.CompilerParams(
            dimension_semantics=("arbitrary",)),
    )(*inputs)


# --------------------------- parameter construction --------------------------
def init_params(key):
    n_keys = 3 + LAYERS * 6
    keys = iter(jax.random.split(key, n_keys))

    def nrm(shape):
        return 0.02 * jax.random.normal(next(keys), shape, dtype=jnp.float32)

    params = {
        "word_emb": nrm((VOCAB, HIDDEN)),
        "pos_emb": nrm((MAX_POS, HIDDEN)),
        "type_emb": nrm((1, HIDDEN)),
        "emb_ln_g": jnp.ones((HIDDEN,), jnp.float32),
        "emb_ln_b": jnp.zeros((HIDDEN,), jnp.float32),
        "layers": [],
    }
    for _ in range(LAYERS):
        layer = {
            "wq": nrm((HIDDEN, HIDDEN)), "bq": jnp.zeros((HIDDEN,), jnp.float32),
            "wk": nrm((HIDDEN, HIDDEN)), "bk": jnp.zeros((HIDDEN,), jnp.float32),
            "wv": nrm((HIDDEN, HIDDEN)), "bv": jnp.zeros((HIDDEN,), jnp.float32),
            "wo": nrm((HIDDEN, HIDDEN)), "bo": jnp.zeros((HIDDEN,), jnp.float32),
            "ln1_g": jnp.ones((HIDDEN,), jnp.float32),
            "ln1_b": jnp.zeros((HIDDEN,), jnp.float32),
            "w1": nrm((HIDDEN, INTER)), "b1": jnp.zeros((INTER,), jnp.float32),
            "w2": nrm((INTER, HIDDEN)), "b2": jnp.zeros((HIDDEN,), jnp.float32),
            "ln2_g": jnp.ones((HIDDEN,), jnp.float32),
            "ln2_b": jnp.zeros((HIDDEN,), jnp.float32),
        }
        params["layers"].append(layer)
    return params


def pack_params(params):
    """Consolidate weights into 8 packed arrays for the kernel."""
    layers = params["layers"]

    def stk(key):
        return jnp.stack([lyr[key] for lyr in layers], axis=0)

    wqkv = jnp.concatenate([stk("wq"), stk("wk"), stk("wv")], axis=-1)  # (L,H,3H)
    bqkv = jnp.concatenate([stk("bq"), stk("bk"), stk("bv")],
                           axis=-1).reshape(LAYERS, 1, 3 * HIDDEN)
    wo = stk("wo")                                                      # (L,H,H)
    vecs = jnp.stack([stk("bo"), stk("ln1_g"), stk("ln1_b"),
                      stk("b2"), stk("ln2_g"), stk("ln2_b")], axis=1)   # (L,6,H)
    w1 = stk("w1")                                                      # (L,H,INTER)
    b1 = stk("b1").reshape(LAYERS, 1, INTER)
    w2 = stk("w2")                                                      # (L,INTER,H)
    embln = jnp.stack([params["emb_ln_g"], params["emb_ln_b"]], axis=0)  # (2,H)
    return (embln, wqkv, bqkv, wo, vecs, w1, b1, w2)


# --------------------------------- forward ----------------------------------
def radiologic_forward(params, input_ids, attention_mask):
    """Equivalent of RadioLOGIC.forward: RoBERTa encoder, return [:, 0] token."""
    B, S = input_ids.shape

    # RoBERTa position ids: cumsum over non-pad tokens, offset by padding_idx.
    nonpad = (input_ids != PAD_IDX).astype(jnp.int32)
    pos_ids = jnp.cumsum(nonpad, axis=1) * nonpad + PAD_IDX

    # Embedding lookups (gather glue, not a kernel hot path).
    emb = (
        params["word_emb"][input_ids]
        + params["pos_emb"][pos_ids]
        + params["type_emb"][0]
    ).astype(jnp.float32)                               # (B, S, H)

    mask_f = attention_mask.astype(jnp.float32).reshape(B, 1, S)

    weights = pack_params(params)
    pooler = pallas_roberta_encoder(emb, mask_f, weights)   # (B, H) == CLS row
    return pooler


# --------------------------- pure-JAX reference ------------------------------
def reference_forward(params, input_ids, attention_mask):
    nonpad = (input_ids != PAD_IDX).astype(jnp.int32)
    pos_ids = jnp.cumsum(nonpad, axis=1) * nonpad + PAD_IDX
    x = (params["word_emb"][input_ids] + params["pos_emb"][pos_ids]
         + params["type_emb"][0]).astype(jnp.float32)

    def ln(v, g, b):
        mu = jnp.mean(v, -1, keepdims=True)
        var = jnp.mean((v - mu) ** 2, -1, keepdims=True)
        return (v - mu) * jax.lax.rsqrt(var + LN_EPS) * g + b

    x = ln(x, params["emb_ln_g"], params["emb_ln_b"])
    B, S, H = x.shape
    mask_add = (1.0 - attention_mask.astype(jnp.float32))[:, None, None, :] * NEG_INF
    for lyr in params["layers"]:
        q = (x @ lyr["wq"] + lyr["bq"]).reshape(B, S, HEADS, HEAD_DIM)
        k = (x @ lyr["wk"] + lyr["bk"]).reshape(B, S, HEADS, HEAD_DIM)
        v = (x @ lyr["wv"] + lyr["bv"]).reshape(B, S, HEADS, HEAD_DIM)
        sc = jnp.einsum("bqhd,bkhd->bhqk", q, k) / math.sqrt(HEAD_DIM) + mask_add
        p = jax.nn.softmax(sc, axis=-1)
        ctx = jnp.einsum("bhqk,bkhd->bqhd", p, v).reshape(B, S, H)
        attn = ctx @ lyr["wo"] + lyr["bo"]
        x = ln(attn + x, lyr["ln1_g"], lyr["ln1_b"])
        h1 = x @ lyr["w1"] + lyr["b1"]
        h1 = 0.5 * h1 * (1.0 + jax.lax.erf(h1 / math.sqrt(2.0)))
        x = ln(h1 @ lyr["w2"] + lyr["b2"] + x, lyr["ln2_g"], lyr["ln2_b"])
    return x[:, 0]


# ----------------------------------- main ------------------------------------
if __name__ == "__main__":
    key = jax.random.PRNGKey(0)
    pkey, ikey = jax.random.split(key)
    params = init_params(pkey)

    B, S = 2, 8
    input_ids = jax.random.randint(ikey, (B, S), 2, VOCAB, dtype=jnp.int32)
    attention_mask = jnp.ones((B, S), dtype=jnp.int32)

    out = radiologic_forward(params, input_ids, attention_mask)
    out = jax.block_until_ready(out)
    assert out.shape == (B, HIDDEN) and out.dtype == jnp.float32

    ref = jax.block_until_ready(reference_forward(params, input_ids,
                                                  attention_mask))
    assert jnp.allclose(out, ref, atol=2e-2, rtol=2e-2), "mismatch vs reference"

    print("KERNEL_OK")
</pallas_src>

<mosaic_0001>
module attributes {stable_mosaic.version = 11 : i64} {
  func.func @_encoder_kernel(%arg0: i32, %arg1: memref<2x8x32xf32, #tpu.memory_space<vmem>>, %arg2: memref<2x1x8xf32, #tpu.memory_space<vmem>>, %arg3: memref<2x32xf32, #tpu.memory_space<vmem>>, %arg4: memref<2x32x96xf32, #tpu.memory_space<vmem>>, %arg5: memref<2x1x96xf32, #tpu.memory_space<vmem>>, %arg6: memref<2x32x32xf32, #tpu.memory_space<vmem>>, %arg7: memref<2x6x32xf32, #tpu.memory_space<vmem>>, %arg8: memref<2x32x64xf32, #tpu.memory_space<vmem>>, %arg9: memref<2x1x64xf32, #tpu.memory_space<vmem>>, %arg10: memref<2x64x32xf32, #tpu.memory_space<vmem>>, %arg11: memref<2x32xf32, #tpu.memory_space<vmem>>) attributes {dimension_semantics = [#tpu.dimension_semantics<arbitrary>], iteration_bounds = array<i64: 1>, scalar_prefetch = 0 : i64, scratch_operands = 0 : i64, tpu.core_type = #tpu.core_type<tc>, window_params = [{pipeline_mode = #tpu.pipeline_mode<synchronous>, transform_indices = @transform_0, window_bounds = array<i64: 2, 8, 32>}, {pipeline_mode = #tpu.pipeline_mode<synchronous>, transform_indices = @transform_1, window_bounds = array<i64: 2, 1, 8>}, {pipeline_mode = #tpu.pipeline_mode<synchronous>, transform_indices = @transform_2, window_bounds = array<i64: 2, 32>}, {pipeline_mode = #tpu.pipeline_mode<synchronous>, transform_indices = @transform_3, window_bounds = array<i64: 2, 32, 96>}, {pipeline_mode = #tpu.pipeline_mode<synchronous>, transform_indices = @transform_4, window_bounds = array<i64: 2, 1, 96>}, {pipeline_mode = #tpu.pipeline_mode<synchronous>, transform_indices = @transform_5, window_bounds = array<i64: 2, 32, 32>}, {pipeline_mode = #tpu.pipeline_mode<synchronous>, transform_indices = @transform_6, window_bounds = array<i64: 2, 6, 32>}, {pipeline_mode = #tpu.pipeline_mode<synchronous>, transform_indices = @transform_7, window_bounds = array<i64: 2, 32, 64>}, {pipeline_mode = #tpu.pipeline_mode<synchronous>, transform_indices = @transform_8, window_bounds = array<i64: 2, 1, 64>}, {pipeline_mode = #tpu.pipeline_mode<synchronous>, transform_indices = @transform_9, window_bounds = array<i64: 2, 64, 32>}, {pipeline_mode = #tpu.pipeline_mode<synchronous>, transform_indices = @transform_10, window_bounds = array<i64: 2, 32>}]} {
    %c0 = arith.constant 0 : index
    %c0_0 = arith.constant 0 : index
    %0 = vector.load %arg3[%c0, %c0_0] : memref<2x32xf32, #tpu.memory_space<vmem>>, vector<2x32xf32>
    %c0_1 = arith.constant 0 : index
    %c0_2 = arith.constant 0 : index
    %c0_3 = arith.constant 0 : index
    %1 = vector.load %arg1[%c0_1, %c0_2, %c0_3] : memref<2x8x32xf32, #tpu.memory_space<vmem>>, vector<2x8x32xf32>
    %2 = vector.shape_cast %1 : vector<2x8x32xf32> to vector<16x32xf32>
    %3 = vector.extract_strided_slice %0 {offsets = [0, 0], sizes = [1, 32], strides = [1, 1]} : vector<2x32xf32> to vector<1x32xf32>
    %4 = vector.extract_strided_slice %0 {offsets = [1, 0], sizes = [1, 32], strides = [1, 1]} : vector<2x32xf32> to vector<1x32xf32>
    %cst = arith.constant dense<0.000000e+00> : vector<16xf32>
    %5 = vector.multi_reduction <add>, %2, %cst [1] : vector<16x32xf32> to vector<16xf32>
    %6 = vector.shape_cast %5 : vector<16xf32> to vector<16x1xf32>
    %cst_4 = arith.constant 3.200000e+01 : f32
    %7 = vector.broadcast %cst_4 : f32 to vector<16x1xf32>
    %8 = arith.divf %6, %7 : vector<16x1xf32>
    %9 = vector.broadcast %8 : vector<16x1xf32> to vector<16x32xf32>
    %10 = arith.subf %2, %9 : vector<16x32xf32>
    %11 = arith.mulf %10, %10 : vector<16x32xf32>
    %cst_5 = arith.constant dense<0.000000e+00> : vector<16xf32>
    %12 = vector.multi_reduction <add>, %11, %cst_5 [1] : vector<16x32xf32> to vector<16xf32>
    %13 = vector.shape_cast %12 : vector<16xf32> to vector<16x1xf32>
    %cst_6 = arith.constant 3.200000e+01 : f32
    %14 = vector.broadcast %cst_6 : f32 to vector<16x1xf32>
    %15 = arith.divf %13, %14 : vector<16x1xf32>
    %16 = vector.broadcast %8 : vector<16x1xf32> to vector<16x32xf32>
    %17 = arith.subf %2, %16 : vector<16x32xf32>
    %cst_7 = arith.constant 9.99999974E-6 : f32
    %18 = vector.broadcast %cst_7 : f32 to vector<16x1xf32>
    %19 = arith.addf %15, %18 : vector<16x1xf32>
    %20 = math.rsqrt %19 : vector<16x1xf32>
    %21 = vector.broadcast %20 : vector<16x1xf32> to vector<16x32xf32>
    %22 = arith.mulf %17, %21 : vector<16x32xf32>
    %23 = vector.broadcast %3 : vector<1x32xf32> to vector<16x32xf32>
    %24 = arith.mulf %22, %23 : vector<16x32xf32>
    %25 = vector.broadcast %4 : vector<1x32xf32> to vector<16x32xf32>
    %26 = arith.addf %24, %25 : vector<16x32xf32>
    %c0_8 = arith.constant 0 : index
    %c0_9 = arith.constant 0 : index
    %c0_10 = arith.constant 0 : index
    %27 = vector.load %arg2[%c0_8, %c0_9, %c0_10] : memref<2x1x8xf32, #tpu.memory_space<vmem>>, vector<2x1x8xf32>
    %cst_11 = arith.constant 1.000000e+00 : f32
    %28 = vector.broadcast %cst_11 : f32 to vector<2x1x8xf32>
    %29 = arith.subf %28, %27 : vector<2x1x8xf32>
    %cst_12 = arith.constant -1.000000e+09 : f32
    %30 = vector.broadcast %cst_12 : f32 to vector<2x1x8xf32>
    %31 = arith.mulf %29, %30 : vector<2x1x8xf32>
    %c0_13 = arith.constant 0 : index
    %c0_14 = arith.constant 0 : index
    %c0_15 = arith.constant 0 : index
    %32 = vector.load %arg7[%c0_13, %c0_14, %c0_15] : memref<2x6x32xf32, #tpu.memory_space<vmem>>, vector<1x6x32xf32>
    %33 = vector.shape_cast %32 : vector<1x6x32xf32> to vector<6x32xf32>
    %c0_16 = arith.constant 0 : index
    %c0_17 = arith.constant 0 : index
    %c0_18 = arith.constant 0 : index
    %34 = vector.load %arg4[%c0_16, %c0_17, %c0_18] : memref<2x32x96xf32, #tpu.memory_space<vmem>>, vector<1x32x96xf32>
    %35 = vector.shape_cast %34 : vector<1x32x96xf32> to vector<32x96xf32>
    %cst_19 = arith.constant dense<0.000000e+00> : vector<16x96xf32>
    %36 = tpu.matmul %26, %35, %cst_19 {dimension_numbers = #tpu.dot_dimension_numbers<[1], [0], [0], [1], [0, 0, 1, 1], [], []>} : vector<16x32xf32>, vector<32x96xf32>, vector<16x96xf32> -> vector<16x96xf32>
    %c0_20 = arith.constant 0 : index
    %c0_21 = arith.constant 0 : index
    %c0_22 = arith.constant 0 : index
    %37 = vector.load %arg5[%c0_20, %c0_21, %c0_22] : memref<2x1x96xf32, #tpu.memory_space<vmem>>, vector<1x1x96xf32>
    %38 = vector.shape_cast %37 : vector<1x1x96xf32> to vector<1x96xf32>
    %39 = vector.broadcast %38 : vector<1x96xf32> to vector<16x96xf32>
    %40 = arith.addf %36, %39 : vector<16x96xf32>
    %41 = vector.shape_cast %40 : vector<16x96xf32> to vector<2x8x96xf32>
    %42 = vector.extract_strided_slice %41 {offsets = [0, 0, 0], sizes = [2, 8, 32], strides = [1, 1, 1]} : vector<2x8x96xf32> to vector<2x8x32xf32>
    %43 = vector.extract_strided_slice %41 {offsets = [0, 0, 32], sizes = [2, 8, 32], strides = [1, 1, 1]} : vector<2x8x96xf32> to vector<2x8x32xf32>
    %44 = vector.extract_strided_slice %41 {offsets = [0, 0, 64], sizes = [2, 8, 32], strides = [1, 1, 1]} : vector<2x8x96xf32> to vector<2x8x32xf32>
    %45 = vector.extract_strided_slice %42 {offsets = [0, 0, 0], sizes = [2, 8, 8], strides = [1, 1, 1]} : vector<2x8x32xf32> to vector<2x8x8xf32>
    %46 = vector.extract_strided_slice %43 {offsets = [0, 0, 0], sizes = [2, 8, 8], strides = [1, 1, 1]} : vector<2x8x32xf32> to vector<2x8x8xf32>
    %47 = vector.extract_strided_slice %44 {offsets = [0, 0, 0], sizes = [2, 8, 8], strides = [1, 1, 1]} : vector<2x8x32xf32> to vector<2x8x8xf32>
    "tpu.trace_start"() <{level = 10 : i32, message = "bqd,bkd->bqk"}> : () -> ()
    %cst_23 = arith.constant dense<0.000000e+00> : vector<2x8x8xf32>
    %48 = tpu.matmul %45, %46, %cst_23 {dimension_numbers = #tpu.dot_dimension_numbers<[2], [2], [1], [1], [0, 0, 0, 1, 1, 1], [0], [0]>} : vector<2x8x8xf32>, vector<2x8x8xf32>, vector<2x8x8xf32> -> vector<2x8x8xf32>
    "tpu.trace_stop"() : () -> ()
    %cst_24 = arith.constant 0.353553385 : f32
    %49 = vector.broadcast %cst_24 : f32 to vector<2x8x8xf32>
    %50 = arith.mulf %48, %49 : vector<2x8x8xf32>
    %51 = vector.broadcast %31 : vector<2x1x8xf32> to vector<2x8x8xf32>
    %52 = arith.addf %50, %51 : vector<2x8x8xf32>
    %cst_25 = arith.constant dense<0xFF800000> : vector<2x8xf32>
    %53 = vector.multi_reduction <maximumf>, %52, %cst_25 [2] : vector<2x8x8xf32> to vector<2x8xf32>
    %54 = vector.shape_cast %53 : vector<2x8xf32> to vector<2x8x1xf32>
    %55 = vector.broadcast %54 : vector<2x8x1xf32> to vector<2x8x8xf32>
    %56 = arith.subf %52, %55 : vector<2x8x8xf32>
    %57 = math.exp %56 : vector<2x8x8xf32>
    %cst_26 = arith.constant dense<0.000000e+00> : vector<2x8xf32>
    %58 = vector.multi_reduction <add>, %57, %cst_26 [2] : vector<2x8x8xf32> to vector<2x8xf32>
    %59 = vector.shape_cast %58 : vector<2x8xf32> to vector<2x8x1xf32>
    %60 = vector.broadcast %59 : vector<2x8x1xf32> to vector<2x8x8xf32>
    %61 = arith.divf %57, %60 : vector<2x8x8xf32>
    "tpu.trace_start"() <{level = 10 : i32, message = "bqk,bkd->bqd"}> : () -> ()
    %cst_27 = arith.constant dense<0.000000e+00> : vector<2x8x8xf32>
    %62 = tpu.matmul %61, %47, %cst_27 {dimension_numbers = #tpu.dot_dimension_numbers<[2], [1], [1], [2], [0, 0, 0, 1, 1, 2], [0], [0]>} : vector<2x8x8xf32>, vector<2x8x8xf32>, vector<2x8x8xf32> -> vector<2x8x8xf32>
    "tpu.trace_stop"() : () -> ()
    %63 = vector.extract_strided_slice %42 {offsets = [0, 0, 8], sizes = [2, 8, 8], strides = [1, 1, 1]} : vector<2x8x32xf32> to vector<2x8x8xf32>
    %64 = vector.extract_strided_slice %43 {offsets = [0, 0, 8], sizes = [2, 8, 8], strides = [1, 1, 1]} : vector<2x8x32xf32> to vector<2x8x8xf32>
    %65 = vector.extract_strided_slice %44 {offsets = [0, 0, 8], sizes = [2, 8, 8], strides = [1, 1, 1]} : vector<2x8x32xf32> to vector<2x8x8xf32>
    "tpu.trace_start"() <{level = 10 : i32, message = "bqd,bkd->bqk"}> : () -> ()
    %cst_28 = arith.constant dense<0.000000e+00> : vector<2x8x8xf32>
    %66 = tpu.matmul %63, %64, %cst_28 {dimension_numbers = #tpu.dot_dimension_numbers<[2], [2], [1], [1], [0, 0, 0, 1, 1, 1], [0], [0]>} : vector<2x8x8xf32>, vector<2x8x8xf32>, vector<2x8x8xf32> -> vector<2x8x8xf32>
    "tpu.trace_stop"() : () -> ()
    %cst_29 = arith.constant 0.353553385 : f32
    %67 = vector.broadcast %cst_29 : f32 to vector<2x8x8xf32>
    %68 = arith.mulf %66, %67 : vector<2x8x8xf32>
    %69 = vector.broadcast %31 : vector<2x1x8xf32> to vector<2x8x8xf32>
    %70 = arith.addf %68, %69 : vector<2x8x8xf32>
    %cst_30 = arith.constant dense<0xFF800000> : vector<2x8xf32>
    %71 = vector.multi_reduction <maximumf>, %70, %cst_30 [2] : vector<2x8x8xf32> to vector<2x8xf32>
    %72 = vector.shape_cast %71 : vector<2x8xf32> to vector<2x8x1xf32>
    %73 = vector.broadcast %72 : vector<2x8x1xf32> to vector<2x8x8xf32>
    %74 = arith.subf %70, %73 : vector<2x8x8xf32>
    %75 = math.exp %74 : vector<2x8x8xf32>
    %cst_31 = arith.constant dense<0.000000e+00> : vector<2x8xf32>
    %76 = vector.multi_reduction <add>, %75, %cst_31 [2] : vector<2x8x8xf32> to vector<2x8xf32>
    %77 = vector.shape_cast %76 : vector<2x8xf32> to vector<2x8x1xf32>
    %78 = vector.broadcast %77 : vector<2x8x1xf32> to vector<2x8x8xf32>
    %79 = arith.divf %75, %78 : vector<2x8x8xf32>
    "tpu.trace_start"() <{level = 10 : i32, message = "bqk,bkd->bqd"}> : () -> ()
    %cst_32 = arith.constant dense<0.000000e+00> : vector<2x8x8xf32>
    %80 = tpu.matmul %79, %65, %cst_32 {dimension_numbers = #tpu.dot_dimension_numbers<[2], [1], [1], [2], [0, 0, 0, 1, 1, 2], [0], [0]>} : vector<2x8x8xf32>, vector<2x8x8xf32>, vector<2x8x8xf32> -> vector<2x8x8xf32>
    "tpu.trace_stop"() : () -> ()
    %81 = vector.extract_strided_slice %42 {offsets = [0, 0, 16], sizes = [2, 8, 8], strides = [1, 1, 1]} : vector<2x8x32xf32> to vector<2x8x8xf32>
    %82 = vector.extract_strided_slice %43 {offsets = [0, 0, 16], sizes = [2, 8, 8], strides = [1, 1, 1]} : vector<2x8x32xf32> to vector<2x8x8xf32>
    %83 = vector.extract_strided_slice %44 {offsets = [0, 0, 16], sizes = [2, 8, 8], strides = [1, 1, 1]} : vector<2x8x32xf32> to vector<2x8x8xf32>
    "tpu.trace_start"() <{level = 10 : i32, message = "bqd,bkd->bqk"}> : () -> ()
    %cst_33 = arith.constant dense<0.000000e+00> : vector<2x8x8xf32>
    %84 = tpu.matmul %81, %82, %cst_33 {dimension_numbers = #tpu.dot_dimension_numbers<[2], [2], [1], [1], [0, 0, 0, 1, 1, 1], [0], [0]>} : vector<2x8x8xf32>, vector<2x8x8xf32>, vector<2x8x8xf32> -> vector<2x8x8xf32>
    "tpu.trace_stop"() : () -> ()
    %cst_34 = arith.constant 0.353553385 : f32
    %85 = vector.broadcast %cst_34 : f32 to vector<2x8x8xf32>
    %86 = arith.mulf %84, %85 : vector<2x8x8xf32>
    %87 = vector.broadcast %31 : vector<2x1x8xf32> to vector<2x8x8xf32>
    %88 = arith.addf %86, %87 : vector<2x8x8xf32>
    %cst_35 = arith.constant dense<0xFF800000> : vector<2x8xf32>
    %89 = vector.multi_reduction <maximumf>, %88, %cst_35 [2] : vector<2x8x8xf32> to vector<2x8xf32>
    %90 = vector.shape_cast %89 : vector<2x8xf32> to vector<2x8x1xf32>
    %91 = vector.broadcast %90 : vector<2x8x1xf32> to vector<2x8x8xf32>
    %92 = arith.subf %88, %91 : vector<2x8x8xf32>
    %93 = math.exp %92 : vector<2x8x8xf32>
    %cst_36 = arith.constant dense<0.000000e+00> : vector<2x8xf32>
    %94 = vector.multi_reduction <add>, %93, %cst_36 [2] : vector<2x8x8xf32> to vector<2x8xf32>
    %95 = vector.shape_cast %94 : vector<2x8xf32> to vector<2x8x1xf32>
    %96 = vector.broadcast %95 : vector<2x8x1xf32> to vector<2x8x8xf32>
    %97 = arith.divf %93, %96 : vector<2x8x8xf32>
    "tpu.trace_start"() <{level = 10 : i32, message = "bqk,bkd->bqd"}> : () -> ()
    %cst_37 = arith.constant dense<0.000000e+00> : vector<2x8x8xf32>
    %98 = tpu.matmul %97, %83, %cst_37 {dimension_numbers = #tpu.dot_dimension_numbers<[2], [1], [1], [2], [0, 0, 0, 1, 1, 2], [0], [0]>} : vector<2x8x8xf32>, vector<2x8x8xf32>, vector<2x8x8xf32> -> vector<2x8x8xf32>
    "tpu.trace_stop"() : () -> ()
    %99 = vector.extract_strided_slice %42 {offsets = [0, 0, 24], sizes = [2, 8, 8], strides = [1, 1, 1]} : vector<2x8x32xf32> to vector<2x8x8xf32>
    %100 = vector.extract_strided_slice %43 {offsets = [0, 0, 24], sizes = [2, 8, 8], strides = [1, 1, 1]} : vector<2x8x32xf32> to vector<2x8x8xf32>
    %101 = vector.extract_strided_slice %44 {offsets = [0, 0, 24], sizes = [2, 8, 8], strides = [1, 1, 1]} : vector<2x8x32xf32> to vector<2x8x8xf32>
    "tpu.trace_start"() <{level = 10 : i32, message = "bqd,bkd->bqk"}> : () -> ()
    %cst_38 = arith.constant dense<0.000000e+00> : vector<2x8x8xf32>
    %102 = tpu.matmul %99, %100, %cst_38 {dimension_numbers = #tpu.dot_dimension_numbers<[2], [2], [1], [1], [0, 0, 0, 1, 1, 1], [0], [0]>} : vector<2x8x8xf32>, vector<2x8x8xf32>, vector<2x8x8xf32> -> vector<2x8x8xf32>
    "tpu.trace_stop"() : () -> ()
    %cst_39 = arith.constant 0.353553385 : f32
    %103 = vector.broadcast %cst_39 : f32 to vector<2x8x8xf32>
    %104 = arith.mulf %102, %103 : vector<2x8x8xf32>
    %105 = vector.broadcast %31 : vector<2x1x8xf32> to vector<2x8x8xf32>
    %106 = arith.addf %104, %105 : vector<2x8x8xf32>
    %cst_40 = arith.constant dense<0xFF800000> : vector<2x8xf32>
    %107 = vector.multi_reduction <maximumf>, %106, %cst_40 [2] : vector<2x8x8xf32> to vector<2x8xf32>
    %108 = vector.shape_cast %107 : vector<2x8xf32> to vector<2x8x1xf32>
    %109 = vector.broadcast %108 : vector<2x8x1xf32> to vector<2x8x8xf32>
    %110 = arith.subf %106, %109 : vector<2x8x8xf32>
    %111 = math.exp %110 : vector<2x8x8xf32>
    %cst_41 = arith.constant dense<0.000000e+00> : vector<2x8xf32>
    %112 = vector.multi_reduction <add>, %111, %cst_41 [2] : vector<2x8x8xf32> to vector<2x8xf32>
    %113 = vector.shape_cast %112 : vector<2x8xf32> to vector<2x8x1xf32>
    %114 = vector.broadcast %113 : vector<2x8x1xf32> to vector<2x8x8xf32>
    %115 = arith.divf %111, %114 : vector<2x8x8xf32>
    "tpu.trace_start"() <{level = 10 : i32, message = "bqk,bkd->bqd"}> : () -> ()
    %cst_42 = arith.constant dense<0.000000e+00> : vector<2x8x8xf32>
    %116 = tpu.matmul %115, %101, %cst_42 {dimension_numbers = #tpu.dot_dimension_numbers<[2], [1], [1], [2], [0, 0, 0, 1, 1, 2], [0], [0]>} : vector<2x8x8xf32>, vector<2x8x8xf32>, vector<2x8x8xf32> -> vector<2x8x8xf32>
    "tpu.trace_stop"() : () -> ()
    %117 = tpu.concatenate %62, %80, %98, %116 in 2 : vector<2x8x8xf32>, vector<2x8x8xf32>, vector<2x8x8xf32>, vector<2x8x8xf32> -> vector<2x8x32xf32>
    %118 = vector.shape_cast %117 : vector<2x8x32xf32> to vector<16x32xf32>
    %c0_43 = arith.constant 0 : index
    %c0_44 = arith.constant 0 : index
    %c0_45 = arith.constant 0 : index
    %119 = vector.load %arg6[%c0_43, %c0_44, %c0_45] : memref<2x32x32xf32, #tpu.memory_space<vmem>>, vector<1x32x32xf32>
    %120 = vector.shape_cast %119 : vector<1x32x32xf32> to vector<32x32xf32>
    %cst_46 = arith.constant dense<0.000000e+00> : vector<16x32xf32>
    %121 = tpu.matmul %118, %120, %cst_46 {dimension_numbers = #tpu.dot_dimension_numbers<[1], [0], [0], [1], [0, 0, 1, 1], [], []>} : vector<16x32xf32>, vector<32x32xf32>, vector<16x32xf32> -> vector<16x32xf32>
    %122 = vector.extract_strided_slice %33 {offsets = [0, 0], sizes = [1, 32], strides = [1, 1]} : vector<6x32xf32> to vector<1x32xf32>
    %123 = vector.broadcast %122 : vector<1x32xf32> to vector<16x32xf32>
    %124 = arith.addf %121, %123 : vector<16x32xf32>
    %125 = arith.addf %124, %26 : vector<16x32xf32>
    %126 = vector.extract_strided_slice %33 {offsets = [1, 0], sizes = [1, 32], strides = [1, 1]} : vector<6x32xf32> to vector<1x32xf32>
    %127 = vector.extract_strided_slice %33 {offsets = [2, 0], sizes = [1, 32], strides = [1, 1]} : vector<6x32xf32> to vector<1x32xf32>
    %cst_47 = arith.constant dense<0.000000e+00> : vector<16xf32>
    %128 = vector.multi_reduction <add>, %125, %cst_47 [1] : vector<16x32xf32> to vector<16xf32>
    %129 = vector.shape_cast %128 : vector<16xf32> to vector<16x1xf32>
    %cst_48 = arith.constant 3.200000e+01 : f32
    %130 = vector.broadcast %cst_48 : f32 to vector<16x1xf32>
    %131 = arith.divf %129, %130 : vector<16x1xf32>
    %132 = vector.broadcast %131 : vector<16x1xf32> to vector<16x32xf32>
    %133 = arith.subf %125, %132 : vector<16x32xf32>
    %134 = arith.mulf %133, %133 : vector<16x32xf32>
    %cst_49 = arith.constant dense<0.000000e+00> : vector<16xf32>
    %135 = vector.multi_reduction <add>, %134, %cst_49 [1] : vector<16x32xf32> to vector<16xf32>
    %136 = vector.shape_cast %135 : vector<16xf32> to vector<16x1xf32>
    %cst_50 = arith.constant 3.200000e+01 : f32
    %137 = vector.broadcast %cst_50 : f32 to vector<16x1xf32>
    %138 = arith.divf %136, %137 : vector<16x1xf32>
    %139 = vector.broadcast %131 : vector<16x1xf32> to vector<16x32xf32>
    %140 = arith.subf %125, %139 : vector<16x32xf32>
    %cst_51 = arith.constant 9.99999974E-6 : f32
    %141 = vector.broadcast %cst_51 : f32 to vector<16x1xf32>
    %142 = arith.addf %138, %141 : vector<16x1xf32>
    %143 = math.rsqrt %142 : vector<16x1xf32>
    %144 = vector.broadcast %143 : vector<16x1xf32> to vector<16x32xf32>
    %145 = arith.mulf %140, %144 : vector<16x32xf32>
    %146 = vector.broadcast %126 : vector<1x32xf32> to vector<16x32xf32>
    %147 = arith.mulf %145, %146 : vector<16x32xf32>
    %148 = vector.broadcast %127 : vector<1x32xf32> to vector<16x32xf32>
    %149 = arith.addf %147, %148 : vector<16x32xf32>
    %c0_52 = arith.constant 0 : index
    %c0_53 = arith.constant 0 : index
    %c0_54 = arith.constant 0 : index
    %150 = vector.load %arg8[%c0_52, %c0_53, %c0_54] : memref<2x32x64xf32, #tpu.memory_space<vmem>>, vector<1x32x64xf32>
    %151 = vector.shape_cast %150 : vector<1x32x64xf32> to vector<32x64xf32>
    %cst_55 = arith.constant dense<0.000000e+00> : vector<16x64xf32>
    %152 = tpu.matmul %149, %151, %cst_55 {dimension_numbers = #tpu.dot_dimension_numbers<[1], [0], [0], [1], [0, 0, 1, 1], [], []>} : vector<16x32xf32>, vector<32x64xf32>, vector<16x64xf32> -> vector<16x64xf32>
    %c0_56 = arith.constant 0 : index
    %c0_57 = arith.constant 0 : index
    %c0_58 = arith.constant 0 : index
    %153 = vector.load %arg9[%c0_56, %c0_57, %c0_58] : memref<2x1x64xf32, #tpu.memory_space<vmem>>, vector<1x1x64xf32>
    %154 = vector.shape_cast %153 : vector<1x1x64xf32> to vector<1x64xf32>
    %155 = vector.broadcast %154 : vector<1x64xf32> to vector<16x64xf32>
    %156 = arith.addf %152, %155 : vector<16x64xf32>
    %cst_59 = arith.constant 5.000000e-01 : f32
    %157 = vector.broadcast %cst_59 : f32 to vector<16x64xf32>
    %158 = arith.mulf %157, %156 : vector<16x64xf32>
    %cst_60 = arith.constant 0.707106769 : f32
    %159 = vector.broadcast %cst_60 : f32 to vector<16x64xf32>
    %160 = arith.mulf %156, %159 : vector<16x64xf32>
    %161 = math.erf %160 : vector<16x64xf32>
    %cst_61 = arith.constant 1.000000e+00 : f32
    %162 = vector.broadcast %cst_61 : f32 to vector<16x64xf32>
    %163 = arith.addf %162, %161 : vector<16x64xf32>
    %164 = arith.mulf %158, %163 : vector<16x64xf32>
    %c0_62 = arith.constant 0 : index
    %c0_63 = arith.constant 0 : index
    %c0_64 = arith.constant 0 : index
    %165 = vector.load %arg10[%c0_62, %c0_63, %c0_64] : memref<2x64x32xf32, #tpu.memory_space<vmem>>, vector<1x64x32xf32>
    %166 = vector.shape_cast %165 : vector<1x64x32xf32> to vector<64x32xf32>
    %cst_65 = arith.constant dense<0.000000e+00> : vector<16x32xf32>
    %167 = tpu.matmul %164, %166, %cst_65 {dimension_numbers = #tpu.dot_dimension_numbers<[1], [0], [0], [1], [0, 0, 1, 1], [], []>} : vector<16x64xf32>, vector<64x32xf32>, vector<16x32xf32> -> vector<16x32xf32>
    %168 = vector.extract_strided_slice %33 {offsets = [3, 0], sizes = [1, 32], strides = [1, 1]} : vector<6x32xf32> to vector<1x32xf32>
    %169 = vector.broadcast %168 : vector<1x32xf32> to vector<16x32xf32>
    %170 = arith.addf %167, %169 : vector<16x32xf32>
    %171 = arith.addf %170, %149 : vector<16x32xf32>
    %172 = vector.extract_strided_slice %33 {offsets = [4, 0], sizes = [1, 32], strides = [1, 1]} : vector<6x32xf32> to vector<1x32xf32>
    %173 = vector.extract_strided_slice %33 {offsets = [5, 0], sizes = [1, 32], strides = [1, 1]} : vector<6x32xf32> to vector<1x32xf32>
    %cst_66 = arith.constant dense<0.000000e+00> : vector<16xf32>
    %174 = vector.multi_reduction <add>, %171, %cst_66 [1] : vector<16x32xf32> to vector<16xf32>
    %175 = vector.shape_cast %174 : vector<16xf32> to vector<16x1xf32>
    %cst_67 = arith.constant 3.200000e+01 : f32
    %176 = vector.broadcast %cst_67 : f32 to vector<16x1xf32>
    %177 = arith.divf %175, %176 : vector<16x1xf32>
    %178 = vector.broadcast %177 : vector<16x1xf32> to vector<16x32xf32>
    %179 = arith.subf %171, %178 : vector<16x32xf32>
    %180 = arith.mulf %179, %179 : vector<16x32xf32>
    %cst_68 = arith.constant dense<0.000000e+00> : vector<16xf32>
    %181 = vector.multi_reduction <add>, %180, %cst_68 [1] : vector<16x32xf32> to vector<16xf32>
    %182 = vector.shape_cast %181 : vector<16xf32> to vector<16x1xf32>
    %cst_69 = arith.constant 3.200000e+01 : f32
    %183 = vector.broadcast %cst_69 : f32 to vector<16x1xf32>
    %184 = arith.divf %182, %183 : vector<16x1xf32>
    %185 = vector.broadcast %177 : vector<16x1xf32> to vector<16x32xf32>
    %186 = arith.subf %171, %185 : vector<16x32xf32>
    %cst_70 = arith.constant 9.99999974E-6 : f32
    %187 = vector.broadcast %cst_70 : f32 to vector<16x1xf32>
    %188 = arith.addf %184, %187 : vector<16x1xf32>
    %189 = math.rsqrt %188 : vector<16x1xf32>
    %190 = vector.broadcast %189 : vector<16x1xf32> to vector<16x32xf32>
    %191 = arith.mulf %186, %190 : vector<16x32xf32>
    %192 = vector.broadcast %172 : vector<1x32xf32> to vector<16x32xf32>
    %193 = arith.mulf %191, %192 : vector<16x32xf32>
    %194 = vector.broadcast %173 : vector<1x32xf32> to vector<16x32xf32>
    %195 = arith.addf %193, %194 : vector<16x32xf32>
    %c1 = arith.constant 1 : index
    %c0_71 = arith.constant 0 : index
    %c0_72 = arith.constant 0 : index
    %196 = vector.load %arg7[%c1, %c0_71, %c0_72] : memref<2x6x32xf32, #tpu.memory_space<vmem>>, vector<1x6x32xf32>
    %197 = vector.shape_cast %196 : vector<1x6x32xf32> to vector<6x32xf32>
    %c1_73 = arith.constant 1 : index
    %c0_74 = arith.constant 0 : index
    %c0_75 = arith.constant 0 : index
    %198 = vector.load %arg4[%c1_73, %c0_74, %c0_75] : memref<2x32x96xf32, #tpu.memory_space<vmem>>, vector<1x32x96xf32>
    %199 = vector.shape_cast %198 : vector<1x32x96xf32> to vector<32x96xf32>
    %cst_76 = arith.constant dense<0.000000e+00> : vector<16x96xf32>
    %200 = tpu.matmul %195, %199, %cst_76 {dimension_numbers = #tpu.dot_dimension_numbers<[1], [0], [0], [1], [0, 0, 1, 1], [], []>} : vector<16x32xf32>, vector<32x96xf32>, vector<16x96xf32> -> vector<16x96xf32>
    %c1_77 = arith.constant 1 : index
    %c0_78 = arith.constant 0 : index
    %c0_79 = arith.constant 0 : index
    %201 = vector.load %arg5[%c1_77, %c0_78, %c0_79] : memref<2x1x96xf32, #tpu.memory_space<vmem>>, vector<1x1x96xf32>
    %202 = vector.shape_cast %201 : vector<1x1x96xf32> to vector<1x96xf32>
    %203 = vector.broadcast %202 : vector<1x96xf32> to vector<16x96xf32>
    %204 = arith.addf %200, %203 : vector<16x96xf32>
    %205 = vector.shape_cast %204 : vector<16x96xf32> to vector<2x8x96xf32>
    %206 = vector.extract_strided_slice %205 {offsets = [0, 0, 0], sizes = [2, 8, 32], strides = [1, 1, 1]} : vector<2x8x96xf32> to vector<2x8x32xf32>
    %207 = vector.extract_strided_slice %205 {offsets = [0, 0, 32], sizes = [2, 8, 32], strides = [1, 1, 1]} : vector<2x8x96xf32> to vector<2x8x32xf32>
    %208 = vector.extract_strided_slice %205 {offsets = [0, 0, 64], sizes = [2, 8, 32], strides = [1, 1, 1]} : vector<2x8x96xf32> to vector<2x8x32xf32>
    %209 = vector.extract_strided_slice %206 {offsets = [0, 0, 0], sizes = [2, 8, 8], strides = [1, 1, 1]} : vector<2x8x32xf32> to vector<2x8x8xf32>
    %210 = vector.extract_strided_slice %207 {offsets = [0, 0, 0], sizes = [2, 8, 8], strides = [1, 1, 1]} : vector<2x8x32xf32> to vector<2x8x8xf32>
    %211 = vector.extract_strided_slice %208 {offsets = [0, 0, 0], sizes = [2, 8, 8], strides = [1, 1, 1]} : vector<2x8x32xf32> to vector<2x8x8xf32>
    "tpu.trace_start"() <{level = 10 : i32, message = "bqd,bkd->bqk"}> : () -> ()
    %cst_80 = arith.constant dense<0.000000e+00> : vector<2x8x8xf32>
    %212 = tpu.matmul %209, %210, %cst_80 {dimension_numbers = #tpu.dot_dimension_numbers<[2], [2], [1], [1], [0, 0, 0, 1, 1, 1], [0], [0]>} : vector<2x8x8xf32>, vector<2x8x8xf32>, vector<2x8x8xf32> -> vector<2x8x8xf32>
    "tpu.trace_stop"() : () -> ()
    %cst_81 = arith.constant 0.353553385 : f32
    %213 = vector.broadcast %cst_81 : f32 to vector<2x8x8xf32>
    %214 = arith.mulf %212, %213 : vector<2x8x8xf32>
    %215 = vector.broadcast %31 : vector<2x1x8xf32> to vector<2x8x8xf32>
    %216 = arith.addf %214, %215 : vector<2x8x8xf32>
    %cst_82 = arith.constant dense<0xFF800000> : vector<2x8xf32>
    %217 = vector.multi_reduction <maximumf>, %216, %cst_82 [2] : vector<2x8x8xf32> to vector<2x8xf32>
    %218 = vector.shape_cast %217 : vector<2x8xf32> to vector<2x8x1xf32>
    %219 = vector.broadcast %218 : vector<2x8x1xf32> to vector<2x8x8xf32>
    %220 = arith.subf %216, %219 : vector<2x8x8xf32>
    %221 = math.exp %220 : vector<2x8x8xf32>
    %cst_83 = arith.constant dense<0.000000e+00> : vector<2x8xf32>
    %222 = vector.multi_reduction <add>, %221, %cst_83 [2] : vector<2x8x8xf32> to vector<2x8xf32>
    %223 = vector.shape_cast %222 : vector<2x8xf32> to vector<2x8x1xf32>
    %224 = vector.broadcast %223 : vector<2x8x1xf32> to vector<2x8x8xf32>
    %225 = arith.divf %221, %224 : vector<2x8x8xf32>
    "tpu.trace_start"() <{level = 10 : i32, message = "bqk,bkd->bqd"}> : () -> ()
    %cst_84 = arith.constant dense<0.000000e+00> : vector<2x8x8xf32>
    %226 = tpu.matmul %225, %211, %cst_84 {dimension_numbers = #tpu.dot_dimension_numbers<[2], [1], [1], [2], [0, 0, 0, 1, 1, 2], [0], [0]>} : vector<2x8x8xf32>, vector<2x8x8xf32>, vector<2x8x8xf32> -> vector<2x8x8xf32>
    "tpu.trace_stop"() : () -> ()
    %227 = vector.extract_strided_slice %206 {offsets = [0, 0, 8], sizes = [2, 8, 8], strides = [1, 1, 1]} : vector<2x8x32xf32> to vector<2x8x8xf32>
    %228 = vector.extract_strided_slice %207 {offsets = [0, 0, 8], sizes = [2, 8, 8], strides = [1, 1, 1]} : vector<2x8x32xf32> to vector<2x8x8xf32>
    %229 = vector.extract_strided_slice %208 {offsets = [0, 0, 8], sizes = [2, 8, 8], strides = [1, 1, 1]} : vector<2x8x32xf32> to vector<2x8x8xf32>
    "tpu.trace_start"() <{level = 10 : i32, message = "bqd,bkd->bqk"}> : () -> ()
    %cst_85 = arith.constant dense<0.000000e+00> : vector<2x8x8xf32>
    %230 = tpu.matmul %227, %228, %cst_85 {dimension_numbers = #tpu.dot_dimension_numbers<[2], [2], [1], [1], [0, 0, 0, 1, 1, 1], [0], [0]>} : vector<2x8x8xf32>, vector<2x8x8xf32>, vector<2x8x8xf32> -> vector<2x8x8xf32>
    "tpu.trace_stop"() : () -> ()
    %cst_86 = arith.constant 0.353553385 : f32
    %231 = vector.broadcast %cst_86 : f32 to vector<2x8x8xf32>
    %232 = arith.mulf %230, %231 : vector<2x8x8xf32>
    %233 = vector.broadcast %31 : vector<2x1x8xf32> to vector<2x8x8xf32>
    %234 = arith.addf %232, %233 : vector<2x8x8xf32>
    %cst_87 = arith.constant dense<0xFF800000> : vector<2x8xf32>
    %235 = vector.multi_reduction <maximumf>, %234, %cst_87 [2] : vector<2x8x8xf32> to vector<2x8xf32>
    %236 = vector.shape_cast %235 : vector<2x8xf32> to vector<2x8x1xf32>
    %237 = vector.broadcast %236 : vector<2x8x1xf32> to vector<2x8x8xf32>
    %238 = arith.subf %234, %237 : vector<2x8x8xf32>
    %239 = math.exp %238 : vector<2x8x8xf32>
    %cst_88 = arith.constant dense<0.000000e+00> : vector<2x8xf32>
    %240 = vector.multi_reduction <add>, %239, %cst_88 [2] : vector<2x8x8xf32> to vector<2x8xf32>
    %241 = vector.shape_cast %240 : vector<2x8xf32> to vector<2x8x1xf32>
    %242 = vector.broadcast %241 : vector<2x8x1xf32> to vector<2x8x8xf32>
    %243 = arith.divf %239, %242 : vector<2x8x8xf32>
    "tpu.trace_start"() <{level = 10 : i32, message = "bqk,bkd->bqd"}> : () -> ()
    %cst_89 = arith.constant dense<0.000000e+00> : vector<2x8x8xf32>
    %244 = tpu.matmul %243, %229, %cst_89 {dimension_numbers = #tpu.dot_dimension_numbers<[2], [1], [1], [2], [0, 0, 0, 1, 1, 2], [0], [0]>} : vector<2x8x8xf32>, vector<2x8x8xf32>, vector<2x8x8xf32> -> vector<2x8x8xf32>
    "tpu.trace_stop"() : () -> ()
    %245 = vector.extract_strided_slice %206 {offsets = [0, 0, 16], sizes = [2, 8, 8], strides = [1, 1, 1]} : vector<2x8x32xf32> to vector<2x8x8xf32>
    %246 = vector.extract_strided_slice %207 {offsets = [0, 0, 16], sizes = [2, 8, 8], strides = [1, 1, 1]} : vector<2x8x32xf32> to vector<2x8x8xf32>
    %247 = vector.extract_strided_slice %208 {offsets = [0, 0, 16], sizes = [2, 8, 8], strides = [1, 1, 1]} : vector<2x8x32xf32> to vector<2x8x8xf32>
    "tpu.trace_start"() <{level = 10 : i32, message = "bqd,bkd->bqk"}> : () -> ()
    %cst_90 = arith.constant dense<0.000000e+00> : vector<2x8x8xf32>
    %248 = tpu.matmul %245, %246, %cst_90 {dimension_numbers = #tpu.dot_dimension_numbers<[2], [2], [1], [1], [0, 0, 0, 1, 1, 1], [0], [0]>} : vector<2x8x8xf32>, vector<2x8x8xf32>, vector<2x8x8xf32> -> vector<2x8x8xf32>
    "tpu.trace_stop"() : () -> ()
    %cst_91 = arith.constant 0.353553385 : f32
    %249 = vector.broadcast %cst_91 : f32 to vector<2x8x8xf32>
    %250 = arith.mulf %248, %249 : vector<2x8x8xf32>
    %251 = vector.broadcast %31 : vector<2x1x8xf32> to vector<2x8x8xf32>
    %252 = arith.addf %250, %251 : vector<2x8x8xf32>
    %cst_92 = arith.constant dense<0xFF800000> : vector<2x8xf32>
    %253 = vector.multi_reduction <maximumf>, %252, %cst_92 [2] : vector<2x8x8xf32> to vector<2x8xf32>
    %254 = vector.shape_cast %253 : vector<2x8xf32> to vector<2x8x1xf32>
    %255 = vector.broadcast %254 : vector<2x8x1xf32> to vector<2x8x8xf32>
    %256 = arith.subf %252, %255 : vector<2x8x8xf32>
    %257 = math.exp %256 : vector<2x8x8xf32>
    %cst_93 = arith.constant dense<0.000000e+00> : vector<2x8xf32>
    %258 = vector.multi_reduction <add>, %257, %cst_93 [2] : vector<2x8x8xf32> to vector<2x8xf32>
    %259 = vector.shape_cast %258 : vector<2x8xf32> to vector<2x8x1xf32>
    %260 = vector.broadcast %259 : vector<2x8x1xf32> to vector<2x8x8xf32>
    %261 = arith.divf %257, %260 : vector<2x8x8xf32>
    "tpu.trace_start"() <{level = 10 : i32, message = "bqk,bkd->bqd"}> : () -> ()
    %cst_94 = arith.constant dense<0.000000e+00> : vector<2x8x8xf32>
    %262 = tpu.matmul %261, %247, %cst_94 {dimension_numbers = #tpu.dot_dimension_numbers<[2], [1], [1], [2], [0, 0, 0, 1, 1, 2], [0], [0]>} : vector<2x8x8xf32>, vector<2x8x8xf32>, vector<2x8x8xf32> -> vector<2x8x8xf32>
    "tpu.trace_stop"() : () -> ()
    %263 = vector.extract_strided_slice %206 {offsets = [0, 0, 24], sizes = [2, 8, 8], strides = [1, 1, 1]} : vector<2x8x32xf32> to vector<2x8x8xf32>
    %264 = vector.extract_strided_slice %207 {offsets = [0, 0, 24], sizes = [2, 8, 8], strides = [1, 1, 1]} : vector<2x8x32xf32> to vector<2x8x8xf32>
    %265 = vector.extract_strided_slice %208 {offsets = [0, 0, 24], sizes = [2, 8, 8], strides = [1, 1, 1]} : vector<2x8x32xf32> to vector<2x8x8xf32>
    "tpu.trace_start"() <{level = 10 : i32, message = "bqd,bkd->bqk"}> : () -> ()
    %cst_95 = arith.constant dense<0.000000e+00> : vector<2x8x8xf32>
    %266 = tpu.matmul %263, %264, %cst_95 {dimension_numbers = #tpu.dot_dimension_numbers<[2], [2], [1], [1], [0, 0, 0, 1, 1, 1], [0], [0]>} : vector<2x8x8xf32>, vector<2x8x8xf32>, vector<2x8x8xf32> -> vector<2x8x8xf32>
    "tpu.trace_stop"() : () -> ()
    %cst_96 = arith.constant 0.353553385 : f32
    %267 = vector.broadcast %cst_96 : f32 to vector<2x8x8xf32>
    %268 = arith.mulf %266, %267 : vector<2x8x8xf32>
    %269 = vector.broadcast %31 : vector<2x1x8xf32> to vector<2x8x8xf32>
    %270 = arith.addf %268, %269 : vector<2x8x8xf32>
    %cst_97 = arith.constant dense<0xFF800000> : vector<2x8xf32>
    %271 = vector.multi_reduction <maximumf>, %270, %cst_97 [2] : vector<2x8x8xf32> to vector<2x8xf32>
    %272 = vector.shape_cast %271 : vector<2x8xf32> to vector<2x8x1xf32>
    %273 = vector.broadcast %272 : vector<2x8x1xf32> to vector<2x8x8xf32>
    %274 = arith.subf %270, %273 : vector<2x8x8xf32>
    %275 = math.exp %274 : vector<2x8x8xf32>
    %cst_98 = arith.constant dense<0.000000e+00> : vector<2x8xf32>
    %276 = vector.multi_reduction <add>, %275, %cst_98 [2] : vector<2x8x8xf32> to vector<2x8xf32>
    %277 = vector.shape_cast %276 : vector<2x8xf32> to vector<2x8x1xf32>
    %278 = vector.broadcast %277 : vector<2x8x1xf32> to vector<2x8x8xf32>
    %279 = arith.divf %275, %278 : vector<2x8x8xf32>
    "tpu.trace_start"() <{level = 10 : i32, message = "bqk,bkd->bqd"}> : () -> ()
    %cst_99 = arith.constant dense<0.000000e+00> : vector<2x8x8xf32>
    %280 = tpu.matmul %279, %265, %cst_99 {dimension_numbers = #tpu.dot_dimension_numbers<[2], [1], [1], [2], [0, 0, 0, 1, 1, 2], [0], [0]>} : vector<2x8x8xf32>, vector<2x8x8xf32>, vector<2x8x8xf32> -> vector<2x8x8xf32>
    "tpu.trace_stop"() : () -> ()
    %281 = tpu.concatenate %226, %244, %262, %280 in 2 : vector<2x8x8xf32>, vector<2x8x8xf32>, vector<2x8x8xf32>, vector<2x8x8xf32> -> vector<2x8x32xf32>
    %282 = vector.shape_cast %281 : vector<2x8x32xf32> to vector<16x32xf32>
    %c1_100 = arith.constant 1 : index
    %c0_101 = arith.constant 0 : index
    %c0_102 = arith.constant 0 : index
    %283 = vector.load %arg6[%c1_100, %c0_101, %c0_102] : memref<2x32x32xf32, #tpu.memory_space<vmem>>, vector<1x32x32xf32>
    %284 = vector.shape_cast %283 : vector<1x32x32xf32> to vector<32x32xf32>
    %cst_103 = arith.constant dense<0.000000e+00> : vector<16x32xf32>
    %285 = tpu.matmul %282, %284, %cst_103 {dimension_numbers = #tpu.dot_dimension_numbers<[1], [0], [0], [1], [0, 0, 1, 1], [], []>} : vector<16x32xf32>, vector<32x32xf32>, vector<16x32xf32> -> vector<16x32xf32>
    %286 = vector.extract_strided_slice %197 {offsets = [0, 0], sizes = [1, 32], strides = [1, 1]} : vector<6x32xf32> to vector<1x32xf32>
    %287 = vector.broadcast %286 : vector<1x32xf32> to vector<16x32xf32>
    %288 = arith.addf %285, %287 : vector<16x32xf32>
    %289 = arith.addf %288, %195 : vector<16x32xf32>
    %290 = vector.extract_strided_slice %197 {offsets = [1, 0], sizes = [1, 32], strides = [1, 1]} : vector<6x32xf32> to vector<1x32xf32>
    %291 = vector.extract_strided_slice %197 {offsets = [2, 0], sizes = [1, 32], strides = [1, 1]} : vector<6x32xf32> to vector<1x32xf32>
    %cst_104 = arith.constant dense<0.000000e+00> : vector<16xf32>
    %292 = vector.multi_reduction <add>, %289, %cst_104 [1] : vector<16x32xf32> to vector<16xf32>
    %293 = vector.shape_cast %292 : vector<16xf32> to vector<16x1xf32>
    %cst_105 = arith.constant 3.200000e+01 : f32
    %294 = vector.broadcast %cst_105 : f32 to vector<16x1xf32>
    %295 = arith.divf %293, %294 : vector<16x1xf32>
    %296 = vector.broadcast %295 : vector<16x1xf32> to vector<16x32xf32>
    %297 = arith.subf %289, %296 : vector<16x32xf32>
    %298 = arith.mulf %297, %297 : vector<16x32xf32>
    %cst_106 = arith.constant dense<0.000000e+00> : vector<16xf32>
    %299 = vector.multi_reduction <add>, %298, %cst_106 [1] : vector<16x32xf32> to vector<16xf32>
    %300 = vector.shape_cast %299 : vector<16xf32> to vector<16x1xf32>
    %cst_107 = arith.constant 3.200000e+01 : f32
    %301 = vector.broadcast %cst_107 : f32 to vector<16x1xf32>
    %302 = arith.divf %300, %301 : vector<16x1xf32>
    %303 = vector.broadcast %295 : vector<16x1xf32> to vector<16x32xf32>
    %304 = arith.subf %289, %303 : vector<16x32xf32>
    %cst_108 = arith.constant 9.99999974E-6 : f32
    %305 = vector.broadcast %cst_108 : f32 to vector<16x1xf32>
    %306 = arith.addf %302, %305 : vector<16x1xf32>
    %307 = math.rsqrt %306 : vector<16x1xf32>
    %308 = vector.broadcast %307 : vector<16x1xf32> to vector<16x32xf32>
    %309 = arith.mulf %304, %308 : vector<16x32xf32>
    %310 = vector.broadcast %290 : vector<1x32xf32> to vector<16x32xf32>
    %311 = arith.mulf %309, %310 : vector<16x32xf32>
    %312 = vector.broadcast %291 : vector<1x32xf32> to vector<16x32xf32>
    %313 = arith.addf %311, %312 : vector<16x32xf32>
    %c1_109 = arith.constant 1 : index
    %c0_110 = arith.constant 0 : index
    %c0_111 = arith.constant 0 : index
    %314 = vector.load %arg8[%c1_109, %c0_110, %c0_111] : memref<2x32x64xf32, #tpu.memory_space<vmem>>, vector<1x32x64xf32>
    %315 = vector.shape_cast %314 : vector<1x32x64xf32> to vector<32x64xf32>
    %cst_112 = arith.constant dense<0.000000e+00> : vector<16x64xf32>
    %316 = tpu.matmul %313, %315, %cst_112 {dimension_numbers = #tpu.dot_dimension_numbers<[1], [0], [0], [1], [0, 0, 1, 1], [], []>} : vector<16x32xf32>, vector<32x64xf32>, vector<16x64xf32> -> vector<16x64xf32>
    %c1_113 = arith.constant 1 : index
    %c0_114 = arith.constant 0 : index
    %c0_115 = arith.constant 0 : index
    %317 = vector.load %arg9[%c1_113, %c0_114, %c0_115] : memref<2x1x64xf32, #tpu.memory_space<vmem>>, vector<1x1x64xf32>
    %318 = vector.shape_cast %317 : vector<1x1x64xf32> to vector<1x64xf32>
    %319 = vector.broadcast %318 : vector<1x64xf32> to vector<16x64xf32>
    %320 = arith.addf %316, %319 : vector<16x64xf32>
    %cst_116 = arith.constant 5.000000e-01 : f32
    %321 = vector.broadcast %cst_116 : f32 to vector<16x64xf32>
    %322 = arith.mulf %321, %320 : vector<16x64xf32>
    %cst_117 = arith.constant 0.707106769 : f32
    %323 = vector.broadcast %cst_117 : f32 to vector<16x64xf32>
    %324 = arith.mulf %320, %323 : vector<16x64xf32>
    %325 = math.erf %324 : vector<16x64xf32>
    %cst_118 = arith.constant 1.000000e+00 : f32
    %326 = vector.broadcast %cst_118 : f32 to vector<16x64xf32>
    %327 = arith.addf %326, %325 : vector<16x64xf32>
    %328 = arith.mulf %322, %327 : vector<16x64xf32>
    %c1_119 = arith.constant 1 : index
    %c0_120 = arith.constant 0 : index
    %c0_121 = arith.constant 0 : index
    %329 = vector.load %arg10[%c1_119, %c0_120, %c0_121] : memref<2x64x32xf32, #tpu.memory_space<vmem>>, vector<1x64x32xf32>
    %330 = vector.shape_cast %329 : vector<1x64x32xf32> to vector<64x32xf32>
    %cst_122 = arith.constant dense<0.000000e+00> : vector<16x32xf32>
    %331 = tpu.matmul %328, %330, %cst_122 {dimension_numbers = #tpu.dot_dimension_numbers<[1], [0], [0], [1], [0, 0, 1, 1], [], []>} : vector<16x64xf32>, vector<64x32xf32>, vector<16x32xf32> -> vector<16x32xf32>
    %332 = vector.extract_strided_slice %197 {offsets = [3, 0], sizes = [1, 32], strides = [1, 1]} : vector<6x32xf32> to vector<1x32xf32>
    %333 = vector.broadcast %332 : vector<1x32xf32> to vector<16x32xf32>
    %334 = arith.addf %331, %333 : vector<16x32xf32>
    %335 = arith.addf %334, %313 : vector<16x32xf32>
    %336 = vector.extract_strided_slice %197 {offsets = [4, 0], sizes = [1, 32], strides = [1, 1]} : vector<6x32xf32> to vector<1x32xf32>
    %337 = vector.extract_strided_slice %197 {offsets = [5, 0], sizes = [1, 32], strides = [1, 1]} : vector<6x32xf32> to vector<1x32xf32>
    %cst_123 = arith.constant dense<0.000000e+00> : vector<16xf32>
    %338 = vector.multi_reduction <add>, %335, %cst_123 [1] : vector<16x32xf32> to vector<16xf32>
    %339 = vector.shape_cast %338 : vector<16xf32> to vector<16x1xf32>
    %cst_124 = arith.constant 3.200000e+01 : f32
    %340 = vector.broadcast %cst_124 : f32 to vector<16x1xf32>
    %341 = arith.divf %339, %340 : vector<16x1xf32>
    %342 = vector.broadcast %341 : vector<16x1xf32> to vector<16x32xf32>
    %343 = arith.subf %335, %342 : vector<16x32xf32>
    %344 = arith.mulf %343, %343 : vector<16x32xf32>
    %cst_125 = arith.constant dense<0.000000e+00> : vector<16xf32>
    %345 = vector.multi_reduction <add>, %344, %cst_125 [1] : vector<16x32xf32> to vector<16xf32>
    %346 = vector.shape_cast %345 : vector<16xf32> to vector<16x1xf32>
    %cst_126 = arith.constant 3.200000e+01 : f32
    %347 = vector.broadcast %cst_126 : f32 to vector<16x1xf32>
    %348 = arith.divf %346, %347 : vector<16x1xf32>
    %349 = vector.broadcast %341 : vector<16x1xf32> to vector<16x32xf32>
    %350 = arith.subf %335, %349 : vector<16x32xf32>
    %cst_127 = arith.constant 9.99999974E-6 : f32
    %351 = vector.broadcast %cst_127 : f32 to vector<16x1xf32>
    %352 = arith.addf %348, %351 : vector<16x1xf32>
    %353 = math.rsqrt %352 : vector<16x1xf32>
    %354 = vector.broadcast %353 : vector<16x1xf32> to vector<16x32xf32>
    %355 = arith.mulf %350, %354 : vector<16x32xf32>
    %356 = vector.broadcast %336 : vector<1x32xf32> to vector<16x32xf32>
    %357 = arith.mulf %355, %356 : vector<16x32xf32>
    %358 = vector.broadcast %337 : vector<1x32xf32> to vector<16x32xf32>
    %359 = arith.addf %357, %358 : vector<16x32xf32>
    %360 = vector.shape_cast %359 : vector<16x32xf32> to vector<2x8x32xf32>
    %361 = vector.extract_strided_slice %360 {offsets = [0, 0, 0], sizes = [2, 1, 32], strides = [1, 1, 1]} : vector<2x8x32xf32> to vector<2x1x32xf32>
    %362 = vector.shape_cast %361 : vector<2x1x32xf32> to vector<2x32xf32>
    %c0_128 = arith.constant 0 : index
    %c0_129 = arith.constant 0 : index
    %363 = vector.load %arg11[%c0_128, %c0_129] : memref<2x32xf32, #tpu.memory_space<vmem>>, vector<2x32xf32>
    tpu.vector_store %arg11[%c0_128, %c0_129], %362 {strides = array<i32>} : memref<2x32xf32, #tpu.memory_space<vmem>>, vector<2x32xf32>,
    return
  }
  func.func @transform_0(%arg0: i32) -> (i32, i32, i32) {
    %c0_i32 = arith.constant 0 : i32
    %c0_i32_0 = arith.constant 0 : i32
    %c0_i32_1 = arith.constant 0 : i32
    %c0_i32_2 = arith.constant 0 : i32
    return %c0_i32, %c0_i32_0, %c0_i32_1 : i32, i32, i32
  }
  func.func @transform_1(%arg0: i32) -> (i32, i32, i32) {
    %c0_i32 = arith.constant 0 : i32
    %c0_i32_0 = arith.constant 0 : i32
    %c0_i32_1 = arith.constant 0 : i32
    %c0_i32_2 = arith.constant 0 : i32
    return %c0_i32, %c0_i32_0, %c0_i32_1 : i32, i32, i32
  }
  func.func @transform_2(%arg0: i32) -> (i32, i32) {
    %c0_i32 = arith.constant 0 : i32
    %c0_i32_0 = arith.constant 0 : i32
    %c0_i32_1 = arith.constant 0 : i32
    return %c0_i32, %c0_i32_0 : i32, i32
  }
  func.func @transform_3(%arg0: i32) -> (i32, i32, i32) {
    %c0_i32 = arith.constant 0 : i32
    %c0_i32_0 = arith.constant 0 : i32
    %c0_i32_1 = arith.constant 0 : i32
    %c0_i32_2 = arith.constant 0 : i32
    return %c0_i32, %c0_i32_0, %c0_i32_1 : i32, i32, i32
  }
  func.func @transform_4(%arg0: i32) -> (i32, i32, i32) {
    %c0_i32 = arith.constant 0 : i32
    %c0_i32_0 = arith.constant 0 : i32
    %c0_i32_1 = arith.constant 0 : i32
    %c0_i32_2 = arith.constant 0 : i32
    return %c0_i32, %c0_i32_0, %c0_i32_1 : i32, i32, i32
  }
  func.func @transform_5(%arg0: i32) -> (i32, i32, i32) {
    %c0_i32 = arith.constant 0 : i32
    %c0_i32_0 = arith.constant 0 : i32
    %c0_i32_1 = arith.constant 0 : i32
    %c0_i32_2 = arith.constant 0 : i32
    return %c0_i32, %c0_i32_0, %c0_i32_1 : i32, i32, i32
  }
  func.func @transform_6(%arg0: i32) -> (i32, i32, i32) {
    %c0_i32 = arith.constant 0 : i32
    %c0_i32_0 = arith.constant 0 : i32
    %c0_i32_1 = arith.constant 0 : i32
    %c0_i32_2 = arith.constant 0 : i32
    return %c0_i32, %c0_i32_0, %c0_i32_1 : i32, i32, i32
  }
  func.func @transform_7(%arg0: i32) -> (i32, i32, i32) {
    %c0_i32 = arith.constant 0 : i32
    %c0_i32_0 = arith.constant 0 : i32
    %c0_i32_1 = arith.constant 0 : i32
    %c0_i32_2 = arith.constant 0 : i32
    return %c0_i32, %c0_i32_0, %c0_i32_1 : i32, i32, i32
  }
  func.func @transform_8(%arg0: i32) -> (i32, i32, i32) {
    %c0_i32 = arith.constant 0 : i32
    %c0_i32_0 = arith.constant 0 : i32
    %c0_i32_1 = arith.constant 0 : i32
    %c0_i32_2 = arith.constant 0 : i32
    return %c0_i32, %c0_i32_0, %c0_i32_1 : i32, i32, i32
  }
  func.func @transform_9(%arg0: i32) -> (i32, i32, i32) {
    %c0_i32 = arith.constant 0 : i32
    %c0_i32_0 = arith.constant 0 : i32
    %c0_i32_1 = arith.constant 0 : i32
    %c0_i32_2 = arith.constant 0 : i32
    return %c0_i32, %c0_i32_0, %c0_i32_1 : i32, i32, i32
  }
  func.func @transform_10(%arg0: i32) -> (i32, i32) {
    %c0_i32 = arith.constant 0 : i32
    %c0_i32_0 = arith.constant 0 : i32
    %c0_i32_1 = arith.constant 0 : i32
    return %c0_i32, %c0_i32_0 : i32, i32
  }
}

</mosaic_0001>

<bundles_post_ra>
// kernel: tpu_custom_call.1
= control target key start
LH: loop header
LB: loop body
LE: loop exit
PB: predicated region body
PF: predicated region fallthrough
CT: control target
= control target key end

     0   :  { %vm39_vm0 = vcmask 261120   ;;  %s5054_s0 = inlined_call_operand.vmem [shape: f32[2,8,32], index: 0, kind: input, shape index: {}]   ;;  %s5055_s1 = inlined_call_operand.vmem [shape: f32[2,1,8], index: 1, kind: input, shape index: {}]   ;;  %s5056_s2 = inlined_call_operand.vmem [shape: f32[2,32], index: 2, kind: input, shape index: {}]   ;;  %s5057_s3 = inlined_call_operand.vmem [shape: f32[2,32,96], index: 3, kind: input, shape index: {}]   ;;  %s5058_s4 = inlined_call_operand.vmem [shape: f32[2,1,96], index: 4, kind: input, shape index: {}]   ;;  %s5059_s5 = inlined_call_operand.vmem [shape: f32[2,32,32], index: 5, kind: input, shape index: {}]   ;;  %s5060_s6 = inlined_call_operand.vmem [shape: f32[2,6,32], index: 6, kind: input, shape index: {}]   ;;  %s5061_s7 = inlined_call_operand.vmem [shape: f32[2,32,64], index: 7, kind: input, shape index: {}]   ;;  %s5062_s8 = inlined_call_operand.vmem [shape: f32[2,1,64], index: 8, kind: input, shape index: {}]   ;;  %s5063_s9 = inlined_call_operand.vmem [shape: f32[2,64,32], index: 9, kind: input, shape index: {}]   ;;  %s5064_s10 = inlined_call_operand.hbm [shape: f32[2,32], index: 10, kind: output, shape index: {}]  }
   0x1   :  { %v37_v0 = vld [vmem:[%s5054_s0] sm:$0xff]  ;;  %v38_v1 = vld [vmem:[%s5054_s0 + $0x8] sm:$0xff] }
   0x2   :  { %15 = vsyncpa [#allocation3], 0  ;;  %v40_v2 = vsel %vm39_vm0, %v37_v0, 0.0  ;;  %v43_v3 = vsel %vm39_vm0, %v38_v1, 0.0  ;;  %v89_v14 = vld [vmem:[%s5057_s3 + $0x18] sm:$0xff]  ;;  %v88_v15 = vld [vmem:[%s5057_s3 + $0x10] sm:$0xff]  ;;  %v67_v23 = vlaneseq }
   0x3   :  { %41 = vadd.xlane.f32.xlu0 %v40_v2  ;;  %3983 = vmatprep.subr.mxu1 %v89_v14  ;;  %v87_v16 = vld [vmem:[%s5057_s3 + $0x8] sm:$0xff]  ;;  %v86_v17 = vld [vmem:[%s5057_s3] sm:$0xff]  ;;  %v4378_v39 = vmov 0.0   ;;  %vm4379_vm1 = vmmov 0   ;;  %s4380_s27 = smov 96   ;;  %vm181_vm2 = vcmask 64512  }
   0x4   :  { %3984 = vmatpush3.msra.mxu1 %v89_v14  ;;  %v4472_v25 = vshrl.u32 %v67_v23, 7  ;;  %v36_v27 = vld [vmem:[%s5056_s2] sm:$0x3]  ;;  %4004 = vmatprep.subr.mxu0 %v4378_v39  ;;  %s4382_s12 = smov 88   ;;  %s4383_s13 = smov 120   ;;  %vm1554_vm3 = vcmask 195584  }
   0x5   :  { %3985 = vmatprep.subr.mxu1 %v88_v15  ;;  %4006 = vmatprep.mubr.msk.f32.mxu0 %vm4379_vm1, %v4378_v39  ;;  %v3772_v40 = vld [vmem:[%s5058_s4] ss:$0 sm:$0xff]  ;;  %v80_v49 = vld [vmem:[%s5055_s1 + $0x1] sm:$0x1]  ;;  %s4384_s14 = smov 56   ;;  %s4385_s15 = smov 80  }
   0x6   :  { %3986 = vmatpush3.msra.mxu1 %v88_v15  ;;  %v4475_v26 = vsub.s32 0, %v4472_v25  ;;  %v4481_v28 = vsub.s32 1, %v4472_v25  ;;  %v79_v47 = vld [vmem:[%s5055_s1] sm:$0x1]  ;;  %v82_v50 = vsub.f32 1.0, %v80_v49  ;;  %s4381_s1 = smov 64  }
   0x7   :  { %44 = vadd.xlane.f32.xlu0 %v43_v3  ;;  %3987 = vmatprep.subr.mxu1 %v87_v16  ;;  %v81_v48 = vsub.f32 1.0, %v79_v47  ;;  %s4386_s16 = smov 112   ;;  %s4387_s0 = smov 48   ;;  %vm1551_vm4 = vcmask 130048   ;;  %vm1800_vm5 = vcmask 523264   ;;  %vm3753_vm6 = vcmask 1041409  }
   0x8   :  { %3988 = vmatpush3.msra.mxu1 %v87_v16  ;;  %v70_v29 = vrot.slane %v36_v27, %v4475_v26  ;;  %v76_v32 = vrot.slane %v36_v27, %v4481_v28  ;;  %v84_v52 = vmul.f32 -1e+09, %v82_v50  ;;  %s4388_s17 = smov 72   ;;  %s4389_s18 = smov 104   ;;  %vm3756_vm7 = vcmask 254976  }
   0x9   :  { %3989 = vmatprep.subr.mxu1 %v86_v17  ;;  %v83_v51 = vmul.f32 -1e+09, %v81_v48  ;;  %s4390_s19 = smov 40   ;;  %s4391_s20 = smov 8  }
   0xa   :  { %3990 = vmatpush3.msra.mxu1 %v86_v17  ;;  %v4532_v57 = vrot.slane %v84_v52, %v4475_v26  ;;  %s4392_s21 = smov 16   ;;  %s4393_s30 = smov 24  }
   0xb   :  { %3994 = vmatprep.subr.mxu1 %v4378_v39  ;;  %v4529_v53 = vrot.slane %v83_v51, %v4475_v26 }
  0x8c   :  { %v42_v4 = vpop.xlane.xlu0 %41 }
  0x8d   :  { %v47_v5 = vmul.f32 0.03125, %v42_v4 }
  0x8f   :  { %v49_v6 = vsub.f32 %v37_v0, %v47_v5 }
  0x90   :  { %v45_v7 = vpop.xlane.xlu0 %44 }
  0x91   :  { %v48_v8 = vmul.f32 0.03125, %v45_v7  ;;  %v51_v9 = vmul.f32 %v49_v6, %v49_v6 }
  0x93   :  { %v50_v10 = vsub.f32 %v38_v1, %v48_v8  ;;  %v53_v11 = vsel %vm39_vm0, %v51_v9, 0.0 }
  0x94   :  { %54 = vadd.xlane.f32.xlu1 %v53_v11 }
  0x95   :  { %v52_v12 = vmul.f32 %v50_v10, %v50_v10 }
  0x97   :  { %v56_v13 = vsel %vm39_vm0, %v52_v12, 0.0 }
  0x98   :  { %57 = vadd.xlane.f32.xlu1 %v56_v13 }
 0x11d   :  { %v55_v18 = vpop.xlane.xlu1 %54 }
 0x11e   :  { %v59_v19 = vmul.f32 0.03125, %v55_v18 }
 0x120   :  { %v61_v20 = vadd.f32 1e-05, %v59_v19 }
 0x121   :  { %v58_v21 = vpop.xlane.xlu1 %57 }
 0x122   :  { %4264 = vrsqrt.f32 %v61_v20  ;;  %v60_v22 = vmul.f32 0.03125, %v58_v21 }
 0x124   :  { %v62_v24 = vadd.f32 1e-05, %v60_v22 }
 0x126   :  { %4266 = vrsqrt.f32 %v62_v24 }
 0x12f   :  { %v4265_v30 = vpop.eup %4264 }
 0x130   :  { %v65_v31 = vmul.f32 %v4265_v30, %v49_v6 }
 0x132   :  { %v71_v33 = vmul.f32 %v70_v29, %v65_v31 }
 0x133   :  { %v4267_v34 = vpop.eup %4266 }
 0x134   :  { %v66_v35 = vmul.f32 %v4267_v34, %v50_v10  ;;  %v4485_v36 = vadd.f32 %v76_v32, %v71_v33 }
 0x136   :  { %v72_v37 = vmul.f32 %v70_v29, %v66_v35  ;;  %3991 = vmatprep.mubr.msk.f32.mxu1 %vm39_vm0, %v4485_v36 }
 0x138   :  { %v4489_v38 = vadd.f32 %v76_v32, %v72_v37 }
 0x13a   :  { %3992 = vmatmul.mubr.msk.f32.vlgmr.msra.gmra.mxu1 %vm39_vm0, %v4489_v38 }
 0x13b   :  { %3996 = vmatprep.mubr.msk.f32.mxu1 %vm4379_vm1, %v4378_v39 }
 0x1fa   :  { %v3993_v41 = vpop.f32.mrf.mxu1 }
 0x1fb   :  { %v4502_v42 = vadd.f32 %v3993_v41, %v3772_v40 }
 0x1fc   :  { %v169_v43 = vpop.f32.mrf.mxu1 }
 0x1fd   :  { %v4504_v44 = vadd.f32 %v3772_v40, %v169_v43  ;;  %257 = vrot.lane.b32.xlu1 %v4502_v42, %s4380_s27 }
 0x1ff   :  { %179 = vrot.lane.b32.xlu0 %v4504_v44, %s4380_s27 }
 0x26f   :  { %v258_v46 = vpop.permute.xlu1 %257 }
 0x271   :  { %v180_v45 = vpop.permute.xlu0 %179 }
 0x272   :  { %3995 = vmatpush3.xpose.msk.msra.mxu1 %vm181_vm2, %v180_v45 }
 0x273   :  { %3999 = vmatprep.subr.mxu1 %v4378_v39 }
 0x275   :  { %3997 = vmatmul.mubr.msk.f32.vlgmr.msra.gmra.mxu1 %vm181_vm2, %v4504_v44 }
 0x276   :  { %4000 = vmatpush3.xpose.msk.msra.mxu1 %vm181_vm2, %v258_v46  ;;  %4001 = vmatprep.mubr.msk.f32.mxu1 %vm4379_vm1, %v4378_v39 }
 0x277   :  { %4009 = vmatprep.subr.mxu1 %v4378_v39 }
 0x279   :  { %4002 = vmatmul.mubr.msk.f32.vlgmr.msra.gmra.mxu1 %vm181_vm2, %v4502_v42 }
 0x27a   :  { %4011 = vmatprep.mubr.msk.f32.mxu1 %vm4379_vm1, %v4378_v39 }
 0x335   :  { %v252_v54 = vpop.f32.mrf.mxu1 }
 0x336   :  { %v333_v55 = vmul.f32 0.35355338, %v252_v54 }
 0x337   :  { %v3998_v56 = vpop.f32.mrf.mxu1 }
 0x338   :  { %v347_v58 = vadd.f32 %v4529_v53, %v333_v55 }
 0x339   :  { %v329_v59 = vpop.f32.mrf.mxu1 }
 0x33a   :  { %v334_v60 = vmul.f32 0.35355338, %v329_v59  ;;  %v349_v61 = vsel %vm181_vm2, %v347_v58, -inf }
 0x33b   :  { %350 = vmax.xlane.f32.xlu1 %v349_v61  ;;  %v4003_v62 = vpop.f32.mrf.mxu1 }
 0x33c   :  { %v348_v63 = vadd.f32 %v4532_v57, %v334_v60 }
 0x33e   :  { %v352_v0 = vsel %vm181_vm2, %v348_v63, -inf }
 0x33f   :  { %353 = vmax.xlane.f32.xlu0 %v352_v0 }
 0x34c   :  { %447 = vrot.lane.b32.xlu1 %v4502_v42, %s4381_s1 }
 0x350   :  { %525 = vrot.lane.b32.xlu1 %v4504_v44, %s4382_s12 }
 0x354   :  { %603 = vrot.lane.b32.xlu1 %v4502_v42, %s4382_s12 }
 0x3c4   :  { %v351_v1 = vpop.xlane.xlu1 %350 }
 0x3c5   :  { %v355_v2 = vsub.f32 %v347_v58, %v351_v1 }
 0x3c7   :  { %v357_v3 = vmul.f32 1.442695, %v355_v2 }
 0x3c8   :  { %v448_v4 = vpop.permute.xlu1 %447  ;;  %v354_v5 = vpop.xlane.xlu0 %353 }
 0x3c9   :  { %4268 = vpow2.f32 %v357_v3  ;;  %v356_v6 = vsub.f32 %v348_v63, %v354_v5  ;;  %4010 = vmatpush3.msra.mxu1 %v448_v4 }
 0x3ca   :  { %4019 = vmatprep.subr.mxu1 %v4378_v39 }
 0x3cb   :  { %v359_v7 = vmul.f32 1.442695, %v356_v6 }
 0x3cc   :  { %v526_v12 = vpop.permute.xlu1 %525 }
 0x3cd   :  { %4270 = vpow2.f32 %v359_v7 }
 0x3d0   :  { %v604_v13 = vpop.permute.xlu1 %603 }
 0x3d6   :  { %v4269_v8 = vpop.eup %4268 }
 0x3d7   :  { %v361_v9 = vsel %vm181_vm2, %v4269_v8, 0.0 }
 0x3d8   :  { %362 = vadd.xlane.f32.xlu0 %v361_v9 }
 0x3da   :  { %v4271_v10 = vpop.eup %4270 }
 0x3db   :  { %v364_v11 = vsel %vm181_vm2, %v4271_v10, 0.0 }
 0x3dc   :  { %365 = vadd.xlane.f32.xlu1 %v364_v11 }
 0x3ed   :  { %601 = vrot.lane.b32.xlu1 %v4502_v42, %s4383_s13 }
 0x3ee   :  { %371 = vrot.lane.b32.xlu0 %v4504_v44, %s4381_s1 }
 0x3f2   :  { %523 = vrot.lane.b32.xlu0 %v4504_v44, %s4383_s13 }
 0x461   :  { %v363_v14 = vpop.xlane.xlu0 %362 }
 0x462   :  { %4272 = vrcp.f32 %v363_v14 }
 0x465   :  { %v366_v15 = vpop.xlane.xlu1 %365  ;;  %v372_v16 = vpop.permute.xlu0 %371 }
 0x466   :  { %4274 = vrcp.f32 %v366_v15  ;;  %4005 = vmatpush3.msra.mxu0 %v372_v16 }
 0x467   :  { %4014 = vmatprep.subr.mxu0 %v4378_v39 }
 0x469   :  { %v524_v21 = vpop.permute.xlu0 %523  ;;  %v602_v22 = vpop.permute.xlu1 %601 }
 0x46f   :  { %v4273_v17 = vpop.eup %4272 }
 0x470   :  { %v368_v18 = vmul.f32 %v4273_v17, %v4269_v8 }
 0x472   :  { %4007 = vmatmul.mubr.msk.f32.vlgmr.msra.gmra.mxu0 %vm181_vm2, %v368_v18 }
 0x473   :  { %v4275_v19 = vpop.eup %4274  ;;  %4015 = vmatpush3.xpose.msk.msra.mxu0 %vm181_vm2, %v526_v12  ;;  %4016 = vmatprep.mubr.msk.f32.mxu0 %vm4379_vm1, %v4378_v39 }
 0x474   :  { %v370_v20 = vmul.f32 %v4275_v19, %v4271_v10  ;;  %4024 = vmatprep.subr.mxu0 %v4378_v39 }
 0x476   :  { %4012 = vmatmul.mubr.msk.f32.vlgmr.msra.gmra.mxu1 %vm181_vm2, %v370_v20  ;;  %4017 = vmatmul.mubr.msk.f32.vlgmr.msra.gmra.mxu0 %vm181_vm2, %v524_v21 }
 0x477   :  { %4020 = vmatpush3.xpose.msk.msra.mxu1 %vm181_vm2, %v604_v13  ;;  %4021 = vmatprep.mubr.msk.f32.mxu1 %vm4379_vm1, %v4378_v39 }
 0x478   :  { %4029 = vmatprep.subr.mxu1 %v4378_v39  ;;  %4026 = vmatprep.mubr.msk.f32.mxu0 %vm4379_vm1, %v4378_v39 }
 0x47a   :  { %4022 = vmatmul.mubr.msk.f32.vlgmr.msra.gmra.mxu1 %vm181_vm2, %v602_v22 }
 0x47b   :  { %4031 = vmatprep.mubr.msk.f32.mxu1 %vm4379_vm1, %v4378_v39 }
 0x532   :  { %v4570_v23 = vpop.f32.mrf.mxu0 }
 0x534   :  { %v4008_v24 = vpop.f32.mrf.mxu0 }
 0x536   :  { %v4572_v27 = vpop.f32.mrf.mxu1  ;;  %v597_v29 = vpop.f32.mrf.mxu0 }
 0x537   :  { %v679_v30 = vmul.f32 0.35355338, %v597_v29 }
 0x538   :  { %v4013_v31 = vpop.f32.mrf.mxu1  ;;  %v4018_v32 = vpop.f32.mrf.mxu0 }
 0x539   :  { %v681_v33 = vadd.f32 %v679_v30, %v4529_v53 }
 0x53a   :  { %v675_v34 = vpop.f32.mrf.mxu1 }
 0x53b   :  { %v680_v35 = vmul.f32 0.35355338, %v675_v34  ;;  %v683_v37 = vsel %vm181_vm2, %v681_v33, -inf }
 0x53c   :  { %684 = vmax.xlane.f32.xlu0 %v683_v37  ;;  %v4023_v40 = vpop.f32.mrf.mxu1 }
 0x53d   :  { %v682_v41 = vadd.f32 %v680_v35, %v4532_v57 }
 0x53f   :  { %v686_v43 = vsel %vm181_vm2, %v682_v41, -inf }
 0x540   :  { %687 = vmax.xlane.f32.xlu1 %v686_v43 }
 0x551   :  { %781 = vrot.lane.b32.xlu1 %v4502_v42, %s4384_s14 }
 0x552   :  { %705 = vrot.lane.b32.xlu0 %v4504_v44, %s4384_s14 }
 0x555   :  { %859 = vrot.lane.b32.xlu1 %v4504_v44, %s4385_s15 }
 0x559   :  { %937 = vrot.lane.b32.xlu1 %v4502_v42, %s4385_s15 }
 0x55d   :  { %935 = vrot.lane.b32.xlu1 %v4502_v42, %s4386_s16 }
 0x5c5   :  { %v685_v45 = vpop.xlane.xlu0 %684 }
 0x5c6   :  { %v689_v46 = vsub.f32 %v681_v33, %v685_v45 }
 0x5c8   :  { %v691_v47 = vmul.f32 1.442695, %v689_v46 }
 0x5c9   :  { %v706_v48 = vpop.permute.xlu0 %705  ;;  %v688_v49 = vpop.xlane.xlu1 %687 }
 0x5ca   :  { %4276 = vpow2.f32 %v691_v47  ;;  %v690_v50 = vsub.f32 %v682_v41, %v688_v49  ;;  %4025 = vmatpush3.msra.mxu0 %v706_v48 }
 0x5cb   :  { %4034 = vmatprep.subr.mxu0 %v4378_v39 }
 0x5cc   :  { %v693_v51 = vmul.f32 1.442695, %v690_v50 }
 0x5cd   :  { %v782_v52 = vpop.permute.xlu1 %781 }
 0x5ce   :  { %4278 = vpow2.f32 %v693_v51  ;;  %4030 = vmatpush3.msra.mxu1 %v782_v52 }
 0x5cf   :  { %4039 = vmatprep.subr.mxu1 %v4378_v39 }
 0x5d1   :  { %v860_v61 = vpop.permute.xlu1 %859 }
 0x5d5   :  { %v938_v1 = vpop.permute.xlu1 %937 }
 0x5d7   :  { %v4277_v54 = vpop.eup %4276 }
 0x5d8   :  { %v695_v55 = vsel %vm181_vm2, %v4277_v54, 0.0 }
 0x5d9   :  { %696 = vadd.xlane.f32.xlu0 %v695_v55  ;;  %v936_v4 = vpop.permute.xlu1 %935 }
 0x5db   :  { %v4279_v56 = vpop.eup %4278 }
 0x5dc   :  { %v698_v58 = vsel %vm181_vm2, %v4279_v56, 0.0 }
 0x5dd   :  { %699 = vadd.xlane.f32.xlu0 %v698_v58 }
 0x5f3   :  { %857 = vrot.lane.b32.xlu0 %v4504_v44, %s4386_s16 }
 0x662   :  { %v697_v59 = vpop.xlane.xlu0 %696 }
 0x663   :  { %4280 = vrcp.f32 %v697_v59 }
 0x666   :  { %v700_v60 = vpop.xlane.xlu0 %699 }
 0x667   :  { %4282 = vrcp.f32 %v700_v60 }
 0x66a   :  { %v858_v3 = vpop.permute.xlu0 %857 }
 0x670   :  { %v4281_v62 = vpop.eup %4280 }
 0x671   :  { %v702_v63 = vmul.f32 %v4281_v62, %v4277_v54 }
 0x673   :  { %4027 = vmatmul.mubr.msk.f32.vlgmr.msra.gmra.mxu0 %vm181_vm2, %v702_v63 }
 0x674   :  { %v4283_v0 = vpop.eup %4282  ;;  %4035 = vmatpush3.xpose.msk.msra.mxu0 %vm181_vm2, %v860_v61  ;;  %4036 = vmatprep.mubr.msk.f32.mxu0 %vm4379_vm1, %v4378_v39 }
 0x675   :  { %v704_v2 = vmul.f32 %v4283_v0, %v4279_v56  ;;  %4044 = vmatprep.subr.mxu0 %v4378_v39 }
 0x677   :  { %4032 = vmatmul.mubr.msk.f32.vlgmr.msra.gmra.mxu1 %vm181_vm2, %v704_v2  ;;  %4037 = vmatmul.mubr.msk.f32.vlgmr.msra.gmra.mxu0 %vm181_vm2, %v858_v3 }
 0x678   :  { %4040 = vmatpush3.xpose.msk.msra.mxu1 %vm181_vm2, %v938_v1  ;;  %4041 = vmatprep.mubr.msk.f32.mxu1 %vm4379_vm1, %v4378_v39 }
 0x679   :  { %4049 = vmatprep.subr.mxu1 %v4378_v39  ;;  %4046 = vmatprep.mubr.msk.f32.mxu0 %vm4379_vm1, %v4378_v39 }
 0x67b   :  { %4042 = vmatmul.mubr.msk.f32.vlgmr.msra.gmra.mxu1 %vm181_vm2, %v936_v4 }
 0x67c   :  { %4051 = vmatprep.mubr.msk.f32.mxu1 %vm4379_vm1, %v4378_v39 }
 0x733   :  { %v4610_v5 = vpop.f32.mrf.mxu0 }
 0x735   :  { %v4028_v6 = vpop.f32.mrf.mxu0 }
 0x737   :  { %v4612_v7 = vpop.f32.mrf.mxu1  ;;  %v931_v8 = vpop.f32.mrf.mxu0 }
 0x738   :  { %v1013_v9 = vmul.f32 0.35355338, %v931_v8 }
 0x739   :  { %v4033_v10 = vpop.f32.mrf.mxu1  ;;  %v4038_v11 = vpop.f32.mrf.mxu0 }
 0x73a   :  { %v1015_v12 = vadd.f32 %v1013_v9, %v4529_v53 }
 0x73b   :  { %v1009_v13 = vpop.f32.mrf.mxu1 }
 0x73c   :  { %v1014_v14 = vmul.f32 0.35355338, %v1009_v13  ;;  %v1017_v15 = vsel %vm181_vm2, %v1015_v12, -inf }
 0x73d   :  { %1018 = vmax.xlane.f32.xlu0 %v1017_v15  ;;  %v4043_v16 = vpop.f32.mrf.mxu1 }
 0x73e   :  { %v1016_v17 = vadd.f32 %v1014_v14, %v4532_v57 }
 0x740   :  { %v1020_v18 = vsel %vm181_vm2, %v1016_v17, -inf }
 0x741   :  { %1021 = vmax.xlane.f32.xlu1 %v1020_v18 }
 0x752   :  { %1115 = vrot.lane.b32.xlu1 %v4502_v42, %s4387_s0 }
 0x753   :  { %1039 = vrot.lane.b32.xlu0 %v4504_v44, %s4387_s0 }
 0x756   :  { %1193 = vrot.lane.b32.xlu1 %v4504_v44, %s4388_s17 }
 0x75a   :  { %1271 = vrot.lane.b32.xlu1 %v4502_v42, %s4388_s17 }
 0x75e   :  { %1269 = vrot.lane.b32.xlu1 %v4502_v42, %s4389_s18 }
 0x7c6   :  { %v1019_v19 = vpop.xlane.xlu0 %1018 }
 0x7c7   :  { %v1023_v20 = vsub.f32 %v1015_v12, %v1019_v19 }
 0x7c9   :  { %v1025_v21 = vmul.f32 1.442695, %v1023_v20  ;;  %v1559_v20 = vld [vmem:[%s5059_s5 + $0x10] sm:$0xff] }
 0x7ca   :  { %v1040_v22 = vpop.permute.xlu0 %1039  ;;  %v1022_v24 = vpop.xlane.xlu1 %1021 }
 0x7cb   :  { %4284 = vpow2.f32 %v1025_v21  ;;  %v1024_v29 = vsub.f32 %v1016_v17, %v1022_v24  ;;  %4045 = vmatpush3.msra.mxu0 %v1040_v22  ;;  %v1558_v21 = vld [vmem:[%s5059_s5 + $0x8] sm:$0xff]  ;;  %v1557_v22 = vld [vmem:[%s5059_s5] sm:$0xff] }
 0x7cc   :  { %4054 = vmatprep.subr.mxu0 %v4378_v39 }
 0x7cd   :  { %v1027_v30 = vmul.f32 1.442695, %v1024_v29 }
 0x7ce   :  { %v1116_v31 = vpop.permute.xlu1 %1115 }
 0x7cf   :  { %4286 = vpow2.f32 %v1027_v30  ;;  %4050 = vmatpush3.msra.mxu1 %v1116_v31 }
 0x7d0   :  { %4059 = vmatprep.subr.mxu1 %v4378_v39 }
 0x7d2   :  { %v1194_v41 = vpop.permute.xlu1 %1193 }
 0x7d6   :  { %v1272_v47 = vpop.permute.xlu1 %1271 }
 0x7d8   :  { %v4285_v32 = vpop.eup %4284 }
 0x7d9   :  { %v1029_v33 = vsel %vm181_vm2, %v4285_v32, 0.0 }
 0x7da   :  { %1030 = vadd.xlane.f32.xlu0 %v1029_v33  ;;  %v1270_v50 = vpop.permute.xlu1 %1269 }
 0x7dc   :  { %v4287_v34 = vpop.eup %4286 }
 0x7dd   :  { %v1032_v35 = vsel %vm181_vm2, %v4287_v34, 0.0 }
 0x7de   :  { %1033 = vadd.xlane.f32.xlu0 %v1032_v35 }
 0x7f4   :  { %1191 = vrot.lane.b32.xlu0 %v4504_v44, %s4389_s18 }
 0x863   :  { %v1031_v37 = vpop.xlane.xlu0 %1030 }
 0x864   :  { %4288 = vrcp.f32 %v1031_v37 }
 0x867   :  { %v1034_v40 = vpop.xlane.xlu0 %1033 }
 0x868   :  { %4290 = vrcp.f32 %v1034_v40 }
 0x86b   :  { %v1192_v49 = vpop.permute.xlu0 %1191 }
 0x871   :  { %v4289_v43 = vpop.eup %4288 }
 0x872   :  { %v1036_v45 = vmul.f32 %v4289_v43, %v4285_v32 }
 0x874   :  { %4047 = vmatmul.mubr.msk.f32.vlgmr.msra.gmra.mxu0 %vm181_vm2, %v1036_v45 }
 0x875   :  { %v4291_v46 = vpop.eup %4290  ;;  %4055 = vmatpush3.xpose.msk.msra.mxu0 %vm181_vm2, %v1194_v41  ;;  %4056 = vmatprep.mubr.msk.f32.mxu0 %vm4379_vm1, %v4378_v39 }
 0x876   :  { %v1038_v48 = vmul.f32 %v4291_v46, %v4287_v34  ;;  %4064 = vmatprep.subr.mxu0 %v4378_v39 }
 0x878   :  { %4052 = vmatmul.mubr.msk.f32.vlgmr.msra.gmra.mxu1 %vm181_vm2, %v1038_v48  ;;  %4057 = vmatmul.mubr.msk.f32.vlgmr.msra.gmra.mxu0 %vm181_vm2, %v1192_v49 }
 0x879   :  { %4060 = vmatpush3.xpose.msk.msra.mxu1 %vm181_vm2, %v1272_v47  ;;  %4061 = vmatprep.mubr.msk.f32.mxu1 %vm4379_vm1, %v4378_v39 }
 0x87a   :  { %4069 = vmatprep.subr.mxu1 %v4378_v39  ;;  %4066 = vmatprep.mubr.msk.f32.mxu0 %vm4379_vm1, %v4378_v39 }
 0x87c   :  { %4062 = vmatmul.mubr.msk.f32.vlgmr.msra.gmra.mxu1 %vm181_vm2, %v1270_v50 }
 0x87d   :  { %4071 = vmatprep.mubr.msk.f32.mxu1 %vm4379_vm1, %v4378_v39 }
 0x934   :  { %v1111_v51 = vpop.f32.mrf.mxu0 }
 0x936   :  { %v4048_v52 = vpop.f32.mrf.mxu0 }
 0x938   :  { %v1187_v54 = vpop.f32.mrf.mxu1  ;;  %v1265_v55 = vpop.f32.mrf.mxu0 }
 0x939   :  { %v1347_v56 = vmul.f32 0.35355338, %v1265_v55 }
 0x93a   :  { %v4053_v58 = vpop.f32.mrf.mxu1  ;;  %v4058_v59 = vpop.f32.mrf.mxu0 }
 0x93b   :  { %v1349_v60 = vadd.f32 %v1347_v56, %v4529_v53 }
 0x93c   :  { %v1343_v61 = vpop.f32.mrf.mxu1 }
 0x93d   :  { %v1348_v62 = vmul.f32 0.35355338, %v1343_v61  ;;  %v1351_v63 = vsel %vm181_vm2, %v1349_v60, -inf }
 0x93e   :  { %1352 = vmax.xlane.f32.xlu0 %v1351_v63  ;;  %v4063_v0 = vpop.f32.mrf.mxu1 }
 0x93f   :  { %v1350_v1 = vadd.f32 %v1348_v62, %v4532_v57 }
 0x941   :  { %v1354_v2 = vsel %vm181_vm2, %v1350_v1, -inf }
 0x942   :  { %1355 = vmax.xlane.f32.xlu1 %v1354_v2 }
 0x953   :  { %1449 = vrot.lane.b32.xlu1 %v4502_v42, %s4390_s19 }
 0x957   :  { %1527 = vrot.lane.b32.xlu1 %v4610_v5, %s4391_s20 }
 0x95b   :  { %1529 = vrot.lane.b32.xlu1 %v4612_v7, %s4391_s20 }
 0x95f   :  { %1537 = vrot.lane.b32.xlu1 %v1187_v54, %s4392_s21 }
 0x9c7   :  { %v1353_v3 = vpop.xlane.xlu0 %1352 }
 0x9c8   :  { %v1357_v4 = vsub.f32 %v1349_v60, %v1353_v3 }
 0x9ca   :  { %v1359_v6 = vmul.f32 1.442695, %v1357_v4  ;;  %v1688_v4 = vld [vmem:[%s5061_s7 + $0x10] sm:$0xff] }
 0x9cb   :  { %v1356_v8 = vpop.xlane.xlu1 %1355 }
 0x9cc   :  { %4292 = vpow2.f32 %v1359_v6  ;;  %v1358_v9 = vsub.f32 %v1350_v1, %v1356_v8  ;;  %v1687_v6 = vld [vmem:[%s5061_s7 + $0x8] sm:$0xff]  ;;  %v1686_v8 = vld [vmem:[%s5061_s7] sm:$0xff] }
 0x9ce   :  { %v1361_v10 = vmul.f32 1.442695, %v1358_v9 }
 0x9cf   :  { %v1450_v11 = vpop.permute.xlu1 %1449 }
 0x9d0   :  { %4294 = vpow2.f32 %v1361_v10  ;;  %4070 = vmatpush3.msra.mxu1 %v1450_v11 }
 0x9d3   :  { %v1528_v32 = vpop.permute.xlu1 %1527 }
 0x9d4   :  { %v1549_v35 = vsel %vm181_vm2, %v4570_v23, %v1528_v32  ;;  %v4695_v23 = vld [vmem:[%s5060_s6] sm:$0x3f]  ;;  %v1790_v32 = vld [vmem:[%s5063_s9 + $0x10] sm:$0xff] }
 0x9d5   :  { %v1564_v49 = vrot.slane %v4695_v23, %v4475_v26 }
 0x9d7   :  { %v1530_v33 = vpop.permute.xlu1 %1529 }
 0x9d8   :  { %v1550_v45 = vsel %vm181_vm2, %v4572_v27, %v1530_v33  ;;  %v1789_v33 = vld [vmem:[%s5063_s9 + $0x8] sm:$0xff] }
 0x9d9   :  { %v4293_v42 = vpop.eup %4292 }
 0x9da   :  { %v1363_v12 = vsel %vm181_vm2, %v4293_v42, 0.0 }
 0x9db   :  { %1364 = vadd.xlane.f32.xlu0 %v1363_v12  ;;  %v1538_v37 = vpop.permute.xlu1 %1537 }
 0x9dc   :  { %v1553_v46 = vsel %vm1551_vm4, %v1550_v45, %v1538_v37 }
 0x9dd   :  { %v4295_v5 = vpop.eup %4294 }
 0x9de   :  { %v1366_v7 = vsel %vm181_vm2, %v4295_v5, 0.0 }
 0x9df   :  { %1367 = vadd.xlane.f32.xlu0 %v1366_v7  ;;  %v1682_v7 = vsub.s32 2, %v4472_v25 }
 0x9f5   :  { %1373 = vrot.lane.b32.xlu0 %v4504_v44, %s4390_s19  ;;  %v1560_v44 = vld [vmem:[%s5059_s5 + $0x18] sm:$0xff] }
 0x9f9   :  { %1535 = vrot.lane.b32.xlu0 %v1111_v51, %s4392_s21 }
 0xa64   :  { %v1365_v13 = vpop.xlane.xlu0 %1364 }
 0xa65   :  { %4296 = vrcp.f32 %v1365_v13  ;;  %v1677_v13 = vrot.slane %v4695_v23, %v4481_v28 }
 0xa68   :  { %v1368_v14 = vpop.xlane.xlu0 %1367 }
 0xa69   :  { %4298 = vrcp.f32 %v1368_v14 }
 0xa6c   :  { %v1374_v15 = vpop.permute.xlu0 %1373 }
 0xa6d   :  { %4065 = vmatpush3.msra.mxu0 %v1374_v15 }
 0xa6e   :  { %4074 = vmatprep.subr.mxu0 %v1560_v44 }
 0xa70   :  { %v1536_v34 = vpop.permute.xlu0 %1535 }
 0xa71   :  { %v1552_v40 = vsel %vm1551_vm4, %v1549_v35, %v1536_v34  ;;  %v1788_v34 = vld [vmem:[%s5063_s9] sm:$0xff] }
 0xa72   :  { %v4297_v16 = vpop.eup %4296  ;;  %v3801_v35 = vld [vmem:[%s5062_s8] ss:$0 sm:$0xff] }
 0xa73   :  { %v1370_v17 = vmul.f32 %v4297_v16, %v4293_v42  ;;  %v1683_v16 = vrot.slane %v4695_v23, %v1682_v7 }
 0xa75   :  { %4067 = vmatmul.mubr.msk.f32.vlgmr.msra.gmra.mxu0 %vm181_vm2, %v1370_v17 }
 0xa76   :  { %v4299_v18 = vpop.eup %4298  ;;  %4075 = vmatpush3.msra.mxu0 %v1560_v44 }
 0xa77   :  { %v1372_v19 = vmul.f32 %v4299_v18, %v4295_v5  ;;  %4076 = vmatprep.subr.mxu0 %v1559_v20 }
 0xa78   :  { %4077 = vmatpush3.msra.mxu0 %v1559_v20 }
 0xa79   :  { %4072 = vmatmul.mubr.msk.f32.vlgmr.msra.gmra.mxu1 %vm181_vm2, %v1372_v19  ;;  %4078 = vmatprep.subr.mxu0 %v1558_v21 }
 0xa7a   :  { %4079 = vmatpush3.msra.mxu0 %v1558_v21 }
 0xa7b   :  { %4080 = vmatprep.subr.mxu0 %v1557_v22 }
 0xa7c   :  { %4081 = vmatpush3.msra.mxu0 %v1557_v22  ;;  %v1795_v22 = vld [vmem:[%s5063_s9 + $0x38] sm:$0xff] }
 0xa7d   :  { %4096 = vmatprep.subr.mxu0 %v1795_v22 }
 0xb35   :  { %v1445_v24 = vpop.f32.mrf.mxu0 }
 0xb36   :  { %1543 = vrot.lane.b32.xlu0 %v1445_v24, %s4393_s30  ;;  %v1794_v24 = vld [vmem:[%s5063_s9 + $0x30] sm:$0xff] }
 0xb37   :  { %v4068_v29 = vpop.f32.mrf.mxu0 }
 0xb38   :  { %v1793_v29 = vld [vmem:[%s5063_s9 + $0x28] sm:$0xff] }
 0xb39   :  { %v1521_v30 = vpop.f32.mrf.mxu1 }
 0xb3a   :  { %1545 = vrot.lane.b32.xlu1 %v1521_v30, %s4393_s30  ;;  %v1792_v30 = vld [vmem:[%s5063_s9 + $0x20] sm:$0xff] }
 0xb3b   :  { %v4073_v31 = vpop.f32.mrf.mxu1 }
 0xb3c   :  { %v1791_v31 = vld [vmem:[%s5063_s9 + $0x18] sm:$0xff] }
 0xba8   :  { %v1544_v41 = vpop.permute.xlu0 %1543 }
 0xba9   :  { %v1555_v43 = vsel %vm1554_vm3, %v1552_v40, %v1544_v41 }
 0xbaa   :  { %4082 = vmatprep.mubr.msk.f32.mxu0 %vm39_vm0, %v1555_v43 }
 0xbac   :  { %v1546_v47 = vpop.permute.xlu1 %1545 }
 0xbad   :  { %v1556_v48 = vsel %vm1554_vm3, %v1553_v46, %v1546_v47 }
 0xbae   :  { %4083 = vmatmul.mubr.msk.f32.vlgmr.msra.gmra.mxu0 %vm39_vm0, %v1556_v48 }
 0xbaf   :  { %4097 = vmatpush3.msra.mxu0 %v1795_v22  ;;  %v1918_v22 = vsub.s32 5, %v4472_v25 }
 0xbb0   :  { %4098 = vmatprep.subr.mxu0 %v1794_v24 }
 0xbb1   :  { %4099 = vmatpush3.msra.mxu0 %v1794_v24 }
 0xbb2   :  { %4100 = vmatprep.subr.mxu0 %v1793_v29 }
 0xbb3   :  { %4101 = vmatpush3.msra.mxu0 %v1793_v29 }
 0xbb4   :  { %4102 = vmatprep.subr.mxu0 %v1792_v30 }
 0xbb5   :  { %4103 = vmatpush3.msra.mxu0 %v1792_v30 }
 0xbb6   :  { %4104 = vmatprep.subr.mxu0 %v1791_v31 }
 0xbb7   :  { %4105 = vmatpush3.msra.mxu0 %v1791_v31 }
 0xbb8   :  { %4106 = vmatprep.subr.mxu0 %v1790_v32 }
 0xbb9   :  { %4107 = vmatpush3.msra.mxu0 %v1790_v32  ;;  %v1919_v32 = vrot.slane %v4695_v23, %v1918_v22 }
 0xbba   :  { %4108 = vmatprep.subr.mxu0 %v1789_v33 }
 0xbbb   :  { %4109 = vmatpush3.msra.mxu0 %v1789_v33 }
 0xbbc   :  { %4110 = vmatprep.subr.mxu0 %v1788_v34 }
 0xbbd   :  { %4111 = vmatpush3.msra.mxu0 %v1788_v34 }
 0xbbe   :  { %4136 = vmatprep.subr.mxu0 %v4378_v39 }
 0xc6e   :  { %v4084_v50 = vpop.f32.mrf.mxu0 }
 0xc6f   :  { %v1643_v51 = vadd.f32 %v4084_v50, %v1564_v49 }
 0xc70   :  { %v1637_v52 = vpop.f32.mrf.mxu0 }
 0xc71   :  { %v1638_v54 = vadd.f32 %v1637_v52, %v1564_v49  ;;  %v1647_v27 = vadd.f32 %v1643_v51, %v4489_v38 }
 0xc73   :  { %v1651_v55 = vsel %vm39_vm0, %v1647_v27, 0.0  ;;  %v1646_v56 = vadd.f32 %v1638_v54, %v4485_v36  ;;  %v1689_v36 = vld [vmem:[%s5061_s7 + $0x18] sm:$0xff] }
 0xc74   :  { %1652 = vadd.xlane.f32.xlu1 %v1651_v55  ;;  %4085 = vmatprep.subr.mxu1 %v1689_v36  ;;  %v1798_v55 = vsub.s32 3, %v4472_v25 }
 0xc75   :  { %v1648_v58 = vsel %vm39_vm0, %v1646_v56, 0.0  ;;  %4086 = vmatpush3.msra.mxu1 %v1689_v36 }
 0xc76   :  { %1649 = vadd.xlane.f32.xlu0 %v1648_v58  ;;  %4087 = vmatprep.subr.mxu1 %v1688_v4 }
 0xc77   :  { %4088 = vmatpush3.msra.mxu1 %v1688_v4 }
 0xc78   :  { %4089 = vmatprep.subr.mxu1 %v1687_v6 }
 0xc79   :  { %4090 = vmatpush3.msra.mxu1 %v1687_v6 }
 0xc7a   :  { %4091 = vmatprep.subr.mxu1 %v1686_v8 }
 0xc7b   :  { %4092 = vmatpush3.msra.mxu1 %v1686_v8 }
 0xcfd   :  { %v1653_v59 = vpop.xlane.xlu1 %1652 }
 0xcfe   :  { %v1655_v60 = vmul.f32 0.03125, %v1653_v59 }
 0xcff   :  { %v1650_v61 = vpop.xlane.xlu0 %1649 }
 0xd00   :  { %v1654_v62 = vmul.f32 0.03125, %v1650_v61  ;;  %v1657_v63 = vsub.f32 %v1647_v27, %v1655_v60 }
 0xd02   :  { %v1656_v0 = vsub.f32 %v1646_v56, %v1654_v62  ;;  %v1659_v3 = vmul.f32 %v1657_v63, %v1657_v63  ;;  %v1799_v56 = vrot.slane %v4695_v23, %v1798_v55 }
 0xd04   :  { %v1658_v1 = vmul.f32 %v1656_v0, %v1656_v0  ;;  %v1663_v38 = vsel %vm39_vm0, %v1659_v3, 0.0 }
 0xd06   :  { %v1660_v2 = vsel %vm39_vm0, %v1658_v1, 0.0 }
 0xd07   :  { %1661 = vadd.xlane.f32.xlu0 %v1660_v2 }
 0xd0b   :  { %1664 = vadd.xlane.f32.xlu0 %v1663_v38 }
 0xd90   :  { %v1662_v9 = vpop.xlane.xlu0 %1661 }
 0xd91   :  { %v1666_v10 = vmul.f32 0.03125, %v1662_v9 }
 0xd93   :  { %v1668_v11 = vadd.f32 1e-05, %v1666_v10 }
 0xd94   :  { %v1665_v42 = vpop.xlane.xlu0 %1664 }
 0xd95   :  { %4300 = vrsqrt.f32 %v1668_v11  ;;  %v1667_v12 = vmul.f32 0.03125, %v1665_v42  ;;  %v3810_v42 = vld [vmem:[%s5057_s3 + $0x38] sm:$0xff] }
 0xd96   :  { %4115 = vmatprep.subr.mxu1 %v3810_v42 }
 0xd97   :  { %v1669_v5 = vadd.f32 1e-05, %v1667_v12  ;;  %v3809_v12 = vld [vmem:[%s5057_s3 + $0x30] sm:$0xff] }
 0xd99   :  { %4302 = vrsqrt.f32 %v1669_v5  ;;  %v3808_v5 = vld [vmem:[%s5057_s3 + $0x28] sm:$0xff] }
 0xda2   :  { %v4301_v14 = vpop.eup %4300 }
 0xda3   :  { %v1672_v15 = vmul.f32 %v4301_v14, %v1656_v0 }
 0xda5   :  { %v1678_v17 = vmul.f32 %v1677_v13, %v1672_v15 }
 0xda6   :  { %v4303_v18 = vpop.eup %4302 }
 0xda7   :  { %v1673_v19 = vmul.f32 %v4303_v18, %v1657_v63  ;;  %v1684_v44 = vadd.f32 %v1683_v16, %v1678_v17 }
 0xda9   :  { %v1679_v20 = vmul.f32 %v1677_v13, %v1673_v19  ;;  %4093 = vmatprep.mubr.msk.f32.mxu1 %vm39_vm0, %v1684_v44  ;;  %v3807_v13 = vld [vmem:[%s5057_s3 + $0x20] sm:$0xff] }
 0xdab   :  { %v1685_v21 = vadd.f32 %v1683_v16, %v1679_v20 }
 0xdad   :  { %4094 = vmatmul.mubr.msk.f32.vlgmr.msra.gmra.mxu1 %vm39_vm0, %v1685_v21 }
 0xdae   :  { %4116 = vmatpush3.msra.mxu1 %v3810_v42 }
 0xdaf   :  { %4117 = vmatprep.subr.mxu1 %v3809_v12 }
 0xdb0   :  { %4118 = vmatpush3.msra.mxu1 %v3809_v12 }
 0xdb1   :  { %4119 = vmatprep.subr.mxu1 %v3808_v5 }
 0xdb2   :  { %4120 = vmatpush3.msra.mxu1 %v3808_v5 }
 0xdb3   :  { %4121 = vmatprep.subr.mxu1 %v3807_v13 }
 0xdb4   :  { %4122 = vmatpush3.msra.mxu1 %v3807_v13 }
 0xdb5   :  { %4126 = vmatprep.subr.mxu1 %v4378_v39 }
 0xe6d   :  { %v4095_v37 = vpop.f32.mrf.mxu1 }
 0xe6e   :  { %v1775_v40 = vadd.f32 %v4095_v37, %v3801_v35  ;;  %v3812_v37 = vld [vmem:[%s5058_s4 + $0x1] ss:$0 sm:$0xff] }
 0xe6f   :  { %v1769_v41 = vpop.f32.mrf.mxu1 }
 0xe70   :  { %v1781_v43 = vmul.f32 0.70710677, %v1775_v40  ;;  %v1770_v45 = vadd.f32 %v3801_v35, %v1769_v41  ;;  %v1779_v52 = vmul.f32 0.5, %v1775_v40 }
 0xe72   :  { %4304 = verf.f32 %v1781_v43  ;;  %v1780_v46 = vmul.f32 0.70710677, %v1770_v45  ;;  %v1778_v50 = vmul.f32 0.5, %v1770_v45 }
 0xe74   :  { %4306 = verf.f32 %v1780_v46 }
 0xe7f   :  { %v4305_v47 = vpop.eup %4304 }
 0xe80   :  { %v1785_v49 = vadd.f32 1.0, %v4305_v47 }
 0xe81   :  { %v4307_v48 = vpop.eup %4306 }
 0xe82   :  { %v1784_v51 = vadd.f32 1.0, %v4307_v48  ;;  %v1787_v27 = vmul.f32 %v1785_v49, %v1779_v52 }
 0xe84   :  { %v1786_v54 = vmul.f32 %v1784_v51, %v1778_v50 }
 0xe86   :  { %4112 = vmatprep.mubr.msk.f32.mxu0 %vm1800_vm5, %v1786_v54 }
 0xe87   :  { %4113 = vmatmul.mubr.msk.f32.vlgmr.msra.gmra.mxu0 %vm1800_vm5, %v1787_v27 }
 0xe88   :  { %4138 = vmatprep.mubr.msk.f32.mxu0 %vm4379_vm1, %v4378_v39 }
 0xf47   :  { %v4114_v58 = vpop.f32.mrf.mxu0 }
 0xf48   :  { %v1879_v59 = vadd.f32 %v4114_v58, %v1799_v56 }
 0xf49   :  { %v1873_v60 = vpop.f32.mrf.mxu0 }
 0xf4a   :  { %v1874_v61 = vadd.f32 %v1873_v60, %v1799_v56  ;;  %v1883_v62 = vadd.f32 %v1879_v59, %v1685_v21 }
 0xf4c   :  { %v1887_v63 = vsel %vm39_vm0, %v1883_v62, 0.0  ;;  %v1882_v0 = vadd.f32 %v1874_v61, %v1684_v44  ;;  %v1912_v44 = vsub.s32 4, %v4472_v25 }
 0xf4d   :  { %1888 = vadd.xlane.f32.xlu1 %v1887_v63 }
 0xf4e   :  { %v1884_v1 = vsel %vm39_vm0, %v1882_v0, 0.0  ;;  %v1913_v21 = vrot.slane %v4695_v23, %v1912_v44 }
 0xf4f   :  { %1885 = vadd.xlane.f32.xlu0 %v1884_v1 }
 0xfd6   :  { %v1889_v2 = vpop.xlane.xlu1 %1888 }
 0xfd7   :  { %v1891_v3 = vmul.f32 0.03125, %v1889_v2 }
 0xfd8   :  { %v1886_v38 = vpop.xlane.xlu0 %1885 }
 0xfd9   :  { %v1893_v36 = vsub.f32 %v1883_v62, %v1891_v3  ;;  %v1890_v4 = vmul.f32 0.03125, %v1886_v38 }
 0xfdb   :  { %v1892_v6 = vsub.f32 %v1882_v0, %v1890_v4  ;;  %v1895_v8 = vmul.f32 %v1893_v36, %v1893_v36 }
 0xfdd   :  { %v1899_v9 = vsel %vm39_vm0, %v1895_v8, 0.0  ;;  %v1894_v10 = vmul.f32 %v1892_v6, %v1892_v6 }
 0xfde   :  { %1900 = vadd.xlane.f32.xlu1 %v1899_v9 }
 0xfdf   :  { %v1896_v11 = vsel %vm39_vm0, %v1894_v10, 0.0 }
 0xfe0   :  { %1897 = vadd.xlane.f32.xlu0 %v1896_v11 }
0x1067   :  { %v1901_v14 = vpop.xlane.xlu1 %1900 }
0x1068   :  { %v1903_v15 = vmul.f32 0.03125, %v1901_v14 }
0x1069   :  { %v1898_v16 = vpop.xlane.xlu0 %1897 }
0x106a   :  { %v1905_v17 = vadd.f32 1e-05, %v1903_v15  ;;  %v1902_v18 = vmul.f32 0.03125, %v1898_v16 }
0x106c   :  { %4308 = vrsqrt.f32 %v1905_v17  ;;  %v1904_v19 = vadd.f32 1e-05, %v1902_v18 }
0x106e   :  { %4310 = vrsqrt.f32 %v1904_v19 }
0x1079   :  { %v4309_v20 = vpop.eup %4308 }
0x107a   :  { %v1909_v24 = vmul.f32 %v4309_v20, %v1893_v36 }
0x107b   :  { %v4311_v29 = vpop.eup %4310 }
0x107c   :  { %v1908_v30 = vmul.f32 %v4311_v29, %v1892_v6  ;;  %v1915_v31 = vmul.f32 %v1913_v21, %v1909_v24 }
0x107e   :  { %v1914_v33 = vmul.f32 %v1913_v21, %v1908_v30  ;;  %v4788_v35 = vadd.f32 %v1919_v32, %v1915_v31 }
0x1080   :  { %v4786_v34 = vadd.f32 %v1919_v32, %v1914_v33 }
0x1082   :  { %4123 = vmatprep.mubr.msk.f32.mxu1 %vm39_vm0, %v4786_v34 }
0x1083   :  { %4124 = vmatmul.mubr.msk.f32.vlgmr.msra.gmra.mxu1 %vm39_vm0, %v4788_v35 }
0x1084   :  { %4128 = vmatprep.mubr.msk.f32.mxu1 %vm4379_vm1, %v4378_v39 }
0x1143   :  { %v4125_v40 = vpop.f32.mrf.mxu1 }
0x1144   :  { %v4799_v23 = vadd.f32 %v4125_v40, %v3812_v37 }
0x1145   :  { %v2009_v41 = vpop.f32.mrf.mxu1 }
0x1146   :  { %v4801_v43 = vadd.f32 %v3812_v37, %v2009_v41  ;;  %2096 = vrot.lane.b32.xlu1 %v4799_v23, %s4380_s27 }
0x1148   :  { %2019 = vrot.lane.b32.xlu0 %v4801_v43, %s4380_s27 }
0x11b8   :  { %v2097_v46 = vpop.permute.xlu1 %2096 }
0x11ba   :  { %v2020_v45 = vpop.permute.xlu0 %2019 }
0x11bb   :  { %4127 = vmatpush3.xpose.msk.msra.mxu1 %vm181_vm2, %v2020_v45 }
0x11bc   :  { %4131 = vmatprep.subr.mxu1 %v4378_v39 }
0x11be   :  { %4129 = vmatmul.mubr.msk.f32.vlgmr.msra.gmra.mxu1 %vm181_vm2, %v4801_v43 }
0x11bf   :  { %4132 = vmatpush3.xpose.msk.msra.mxu1 %vm181_vm2, %v2097_v46  ;;  %4133 = vmatprep.mubr.msk.f32.mxu1 %vm4379_vm1, %v4378_v39 }
0x11c0   :  { %4141 = vmatprep.subr.mxu1 %v4378_v39 }
0x11c2   :  { %4134 = vmatmul.mubr.msk.f32.vlgmr.msra.gmra.mxu1 %vm181_vm2, %v4799_v23 }
0x11c3   :  { %4143 = vmatprep.mubr.msk.f32.mxu1 %vm4379_vm1, %v4378_v39 }
0x127e   :  { %v2091_v47 = vpop.f32.mrf.mxu1 }
0x127f   :  { %v2172_v48 = vmul.f32 0.35355338, %v2091_v47 }
0x1280   :  { %v4130_v49 = vpop.f32.mrf.mxu1 }
0x1281   :  { %v2174_v50 = vadd.f32 %v2172_v48, %v4529_v53 }
0x1282   :  { %v2168_v51 = vpop.f32.mrf.mxu1 }
0x1283   :  { %v2173_v52 = vmul.f32 0.35355338, %v2168_v51  ;;  %v2176_v54 = vsel %vm181_vm2, %v2174_v50, -inf }
0x1284   :  { %2177 = vmax.xlane.f32.xlu1 %v2176_v54  ;;  %v4135_v27 = vpop.f32.mrf.mxu1 }
0x1285   :  { %v2175_v56 = vadd.f32 %v2173_v52, %v4532_v57 }
0x1287   :  { %v2179_v58 = vsel %vm181_vm2, %v2175_v56, -inf }
0x1288   :  { %2180 = vmax.xlane.f32.xlu0 %v2179_v58 }
0x1295   :  { %2274 = vrot.lane.b32.xlu1 %v4799_v23, %s4381_s1 }
0x1299   :  { %2352 = vrot.lane.b32.xlu1 %v4801_v43, %s4382_s12 }
0x129d   :  { %2430 = vrot.lane.b32.xlu1 %v4799_v23, %s4382_s12 }
0x130d   :  { %v2178_v59 = vpop.xlane.xlu1 %2177 }
0x130e   :  { %v2182_v60 = vsub.f32 %v2174_v50, %v2178_v59 }
0x1310   :  { %v2184_v61 = vmul.f32 1.442695, %v2182_v60 }
0x1311   :  { %v2275_v62 = vpop.permute.xlu1 %2274  ;;  %v2181_v63 = vpop.xlane.xlu0 %2180 }
0x1312   :  { %4312 = vpow2.f32 %v2184_v61  ;;  %v2183_v0 = vsub.f32 %v2175_v56, %v2181_v63  ;;  %4142 = vmatpush3.msra.mxu1 %v2275_v62 }
0x1313   :  { %4151 = vmatprep.subr.mxu1 %v4378_v39 }
0x1314   :  { %v2186_v1 = vmul.f32 1.442695, %v2183_v0 }
0x1315   :  { %v2353_v4 = vpop.permute.xlu1 %2352 }
0x1316   :  { %4314 = vpow2.f32 %v2186_v1 }
0x1319   :  { %v2431_v6 = vpop.permute.xlu1 %2430 }
0x131f   :  { %v4313_v2 = vpop.eup %4312 }
0x1320   :  { %v2188_v3 = vsel %vm181_vm2, %v4313_v2, 0.0 }
0x1321   :  { %2189 = vadd.xlane.f32.xlu0 %v2188_v3 }
0x1323   :  { %v4315_v38 = vpop.eup %4314 }
0x1324   :  { %v2191_v36 = vsel %vm181_vm2, %v4315_v38, 0.0 }
0x1325   :  { %2192 = vadd.xlane.f32.xlu1 %v2191_v36 }
0x1336   :  { %2428 = vrot.lane.b32.xlu1 %v4799_v23, %s4383_s13 }
0x1337   :  { %2198 = vrot.lane.b32.xlu0 %v4801_v43, %s4381_s1 }
0x133b   :  { %2350 = vrot.lane.b32.xlu0 %v4801_v43, %s4383_s13 }
0x13aa   :  { %v2190_v8 = vpop.xlane.xlu0 %2189 }
0x13ab   :  { %4316 = vrcp.f32 %v2190_v8 }
0x13ae   :  { %v2193_v9 = vpop.xlane.xlu1 %2192  ;;  %v2199_v10 = vpop.permute.xlu0 %2198 }
0x13af   :  { %4318 = vrcp.f32 %v2193_v9  ;;  %4137 = vmatpush3.msra.mxu0 %v2199_v10 }
0x13b0   :  { %4146 = vmatprep.subr.mxu0 %v4378_v39 }
0x13b2   :  { %v2351_v13 = vpop.permute.xlu0 %2350  ;;  %v2429_v14 = vpop.permute.xlu1 %2428 }
0x13b8   :  { %v4317_v11 = vpop.eup %4316 }
0x13b9   :  { %v2195_v42 = vmul.f32 %v4317_v11, %v4313_v2 }
0x13bb   :  { %4139 = vmatmul.mubr.msk.f32.vlgmr.msra.gmra.mxu0 %vm181_vm2, %v2195_v42 }
0x13bc   :  { %v4319_v12 = vpop.eup %4318  ;;  %4147 = vmatpush3.xpose.msk.msra.mxu0 %vm181_vm2, %v2353_v4  ;;  %4148 = vmatprep.mubr.msk.f32.mxu0 %vm4379_vm1, %v4378_v39 }
0x13bd   :  { %v2197_v5 = vmul.f32 %v4319_v12, %v4315_v38  ;;  %4156 = vmatprep.subr.mxu0 %v4378_v39 }
0x13bf   :  { %4144 = vmatmul.mubr.msk.f32.vlgmr.msra.gmra.mxu1 %vm181_vm2, %v2197_v5  ;;  %4149 = vmatmul.mubr.msk.f32.vlgmr.msra.gmra.mxu0 %vm181_vm2, %v2351_v13 }
0x13c0   :  { %4152 = vmatpush3.xpose.msk.msra.mxu1 %vm181_vm2, %v2431_v6  ;;  %4153 = vmatprep.mubr.msk.f32.mxu1 %vm4379_vm1, %v4378_v39 }
0x13c1   :  { %4161 = vmatprep.subr.mxu1 %v4378_v39  ;;  %4158 = vmatprep.mubr.msk.f32.mxu0 %vm4379_vm1, %v4378_v39 }
0x13c3   :  { %4154 = vmatmul.mubr.msk.f32.vlgmr.msra.gmra.mxu1 %vm181_vm2, %v2429_v14 }
0x13c4   :  { %4163 = vmatprep.mubr.msk.f32.mxu1 %vm4379_vm1, %v4378_v39 }
0x147b   :  { %v4855_v15 = vpop.f32.mrf.mxu0 }
0x147d   :  { %v4140_v16 = vpop.f32.mrf.mxu0 }
0x147f   :  { %v4857_v17 = vpop.f32.mrf.mxu1  ;;  %v2424_v18 = vpop.f32.mrf.mxu0 }
0x1480   :  { %v2506_v19 = vmul.f32 0.35355338, %v2424_v18 }
0x1481   :  { %v4145_v20 = vpop.f32.mrf.mxu1  ;;  %v4150_v21 = vpop.f32.mrf.mxu0 }
0x1482   :  { %v2508_v24 = vadd.f32 %v2506_v19, %v4529_v53 }
0x1483   :  { %v2502_v29 = vpop.f32.mrf.mxu1 }
0x1484   :  { %v2507_v30 = vmul.f32 0.35355338, %v2502_v29  ;;  %v2510_v31 = vsel %vm181_vm2, %v2508_v24, -inf }
0x1485   :  { %2511 = vmax.xlane.f32.xlu0 %v2510_v31  ;;  %v4155_v32 = vpop.f32.mrf.mxu1 }
0x1486   :  { %v2509_v33 = vadd.f32 %v2507_v30, %v4532_v57 }
0x1488   :  { %v2513_v37 = vsel %vm181_vm2, %v2509_v33, -inf }
0x1489   :  { %2514 = vmax.xlane.f32.xlu1 %v2513_v37 }
0x149a   :  { %2608 = vrot.lane.b32.xlu1 %v4799_v23, %s4384_s14 }
0x149b   :  { %2532 = vrot.lane.b32.xlu0 %v4801_v43, %s4384_s14 }
0x149e   :  { %2686 = vrot.lane.b32.xlu1 %v4801_v43, %s4385_s15 }
0x14a2   :  { %2764 = vrot.lane.b32.xlu1 %v4799_v23, %s4385_s15 }
0x14a6   :  { %2762 = vrot.lane.b32.xlu1 %v4799_v23, %s4386_s16 }
0x150e   :  { %v2512_v40 = vpop.xlane.xlu0 %2511 }
0x150f   :  { %v2516_v41 = vsub.f32 %v2508_v24, %v2512_v40 }
0x1511   :  { %v2518_v45 = vmul.f32 1.442695, %v2516_v41 }
0x1512   :  { %v2533_v46 = vpop.permute.xlu0 %2532  ;;  %v2515_v47 = vpop.xlane.xlu1 %2514 }
0x1513   :  { %4320 = vpow2.f32 %v2518_v45  ;;  %v2517_v48 = vsub.f32 %v2509_v33, %v2515_v47  ;;  %4157 = vmatpush3.msra.mxu0 %v2533_v46 }
0x1514   :  { %4166 = vmatprep.subr.mxu0 %v4378_v39 }
0x1515   :  { %v2520_v49 = vmul.f32 1.442695, %v2517_v48 }
0x1516   :  { %v2609_v50 = vpop.permute.xlu1 %2608 }
0x1517   :  { %4322 = vpow2.f32 %v2520_v49  ;;  %4162 = vmatpush3.msra.mxu1 %v2609_v50 }
0x1518   :  { %4171 = vmatprep.subr.mxu1 %v4378_v39 }
0x151a   :  { %v2687_v59 = vpop.permute.xlu1 %2686 }
0x151e   :  { %v2765_v63 = vpop.permute.xlu1 %2764 }
0x1520   :  { %v4321_v51 = vpop.eup %4320 }
0x1521   :  { %v2522_v52 = vsel %vm181_vm2, %v4321_v51, 0.0 }
0x1522   :  { %2523 = vadd.xlane.f32.xlu0 %v2522_v52  ;;  %v2763_v2 = vpop.permute.xlu1 %2762 }
0x1524   :  { %v4323_v54 = vpop.eup %4322 }
0x1525   :  { %v2525_v27 = vsel %vm181_vm2, %v4323_v54, 0.0 }
0x1526   :  { %2526 = vadd.xlane.f32.xlu0 %v2525_v27 }
0x153c   :  { %2684 = vrot.lane.b32.xlu0 %v4801_v43, %s4386_s16 }
0x15ab   :  { %v2524_v56 = vpop.xlane.xlu0 %2523 }
0x15ac   :  { %4324 = vrcp.f32 %v2524_v56 }
0x15af   :  { %v2527_v58 = vpop.xlane.xlu0 %2526 }
0x15b0   :  { %4326 = vrcp.f32 %v2527_v58 }
0x15b3   :  { %v2685_v1 = vpop.permute.xlu0 %2684 }
0x15b9   :  { %v4325_v60 = vpop.eup %4324 }
0x15ba   :  { %v2529_v61 = vmul.f32 %v4325_v60, %v4321_v51 }
0x15bc   :  { %4159 = vmatmul.mubr.msk.f32.vlgmr.msra.gmra.mxu0 %vm181_vm2, %v2529_v61 }
0x15bd   :  { %v4327_v62 = vpop.eup %4326  ;;  %4167 = vmatpush3.xpose.msk.msra.mxu0 %vm181_vm2, %v2687_v59  ;;  %4168 = vmatprep.mubr.msk.f32.mxu0 %vm4379_vm1, %v4378_v39 }
0x15be   :  { %v2531_v0 = vmul.f32 %v4327_v62, %v4323_v54  ;;  %4176 = vmatprep.subr.mxu0 %v4378_v39 }
0x15c0   :  { %4164 = vmatmul.mubr.msk.f32.vlgmr.msra.gmra.mxu1 %vm181_vm2, %v2531_v0  ;;  %4169 = vmatmul.mubr.msk.f32.vlgmr.msra.gmra.mxu0 %vm181_vm2, %v2685_v1 }
0x15c1   :  { %4172 = vmatpush3.xpose.msk.msra.mxu1 %vm181_vm2, %v2765_v63  ;;  %4173 = vmatprep.mubr.msk.f32.mxu1 %vm4379_vm1, %v4378_v39 }
0x15c2   :  { %4181 = vmatprep.subr.mxu1 %v4378_v39  ;;  %4178 = vmatprep.mubr.msk.f32.mxu0 %vm4379_vm1, %v4378_v39 }
0x15c4   :  { %4174 = vmatmul.mubr.msk.f32.vlgmr.msra.gmra.mxu1 %vm181_vm2, %v2763_v2 }
0x15c5   :  { %4183 = vmatprep.mubr.msk.f32.mxu1 %vm4379_vm1, %v4378_v39 }
0x167c   :  { %v4895_v3 = vpop.f32.mrf.mxu0 }
0x167e   :  { %v4160_v38 = vpop.f32.mrf.mxu0 }
0x1680   :  { %v4897_v36 = vpop.f32.mrf.mxu1  ;;  %v2758_v4 = vpop.f32.mrf.mxu0 }
0x1681   :  { %v2840_v6 = vmul.f32 0.35355338, %v2758_v4 }
0x1682   :  { %v4165_v8 = vpop.f32.mrf.mxu1  ;;  %v4170_v9 = vpop.f32.mrf.mxu0 }
0x1683   :  { %v2842_v10 = vadd.f32 %v2840_v6, %v4529_v53 }
0x1684   :  { %v2836_v11 = vpop.f32.mrf.mxu1 }
0x1685   :  { %v2841_v42 = vmul.f32 0.35355338, %v2836_v11  ;;  %v2844_v12 = vsel %vm181_vm2, %v2842_v10, -inf }
0x1686   :  { %2845 = vmax.xlane.f32.xlu0 %v2844_v12  ;;  %v4175_v5 = vpop.f32.mrf.mxu1 }
0x1687   :  { %v2843_v13 = vadd.f32 %v2841_v42, %v4532_v57 }
0x1689   :  { %v2847_v14 = vsel %vm181_vm2, %v2843_v13, -inf }
0x168a   :  { %2848 = vmax.xlane.f32.xlu1 %v2847_v14 }
0x169b   :  { %2942 = vrot.lane.b32.xlu1 %v4799_v23, %s4387_s0 }
0x169c   :  { %2866 = vrot.lane.b32.xlu0 %v4801_v43, %s4387_s0 }
0x169f   :  { %3020 = vrot.lane.b32.xlu1 %v4801_v43, %s4388_s17 }
0x16a3   :  { %3098 = vrot.lane.b32.xlu1 %v4799_v23, %s4388_s17 }
0x16a7   :  { %3096 = vrot.lane.b32.xlu1 %v4799_v23, %s4389_s18 }
0x170f   :  { %v2846_v16 = vpop.xlane.xlu0 %2845 }
0x1710   :  { %v2850_v18 = vsub.f32 %v2842_v10, %v2846_v16 }
0x1712   :  { %v2852_v19 = vmul.f32 1.442695, %v2850_v18 }
0x1713   :  { %v2867_v20 = vpop.permute.xlu0 %2866  ;;  %v2849_v21 = vpop.xlane.xlu1 %2848 }
0x1714   :  { %4328 = vpow2.f32 %v2852_v19  ;;  %v2851_v24 = vsub.f32 %v2843_v13, %v2849_v21  ;;  %4177 = vmatpush3.msra.mxu0 %v2867_v20  ;;  %v3841_v19 = vld [vmem:[%s5059_s5 + $0x30] sm:$0xff]  ;;  %v3840_v20 = vld [vmem:[%s5059_s5 + $0x28] sm:$0xff]  ;;  %v3839_v21 = vld [vmem:[%s5059_s5 + $0x20] sm:$0xff] }
0x1715   :  { %4186 = vmatprep.subr.mxu0 %v4378_v39 }
0x1716   :  { %v2854_v29 = vmul.f32 1.442695, %v2851_v24 }
0x1717   :  { %v2943_v30 = vpop.permute.xlu1 %2942 }
0x1718   :  { %4330 = vpow2.f32 %v2854_v29  ;;  %4182 = vmatpush3.msra.mxu1 %v2943_v30 }
0x1719   :  { %4191 = vmatprep.subr.mxu1 %v4378_v39 }
0x171b   :  { %v3021_v45 = vpop.permute.xlu1 %3020 }
0x171f   :  { %v3099_v49 = vpop.permute.xlu1 %3098 }
0x1721   :  { %v4329_v31 = vpop.eup %4328 }
0x1722   :  { %v2856_v32 = vsel %vm181_vm2, %v4329_v31, 0.0 }
0x1723   :  { %2857 = vadd.xlane.f32.xlu0 %v2856_v32  ;;  %v3097_v52 = vpop.permute.xlu1 %3096 }
0x1725   :  { %v4331_v33 = vpop.eup %4330 }
0x1726   :  { %v2859_v37 = vsel %vm181_vm2, %v4331_v33, 0.0 }
0x1727   :  { %2860 = vadd.xlane.f32.xlu0 %v2859_v37 }
0x173d   :  { %3018 = vrot.lane.b32.xlu0 %v4801_v43, %s4389_s18 }
0x17ac   :  { %v2858_v40 = vpop.xlane.xlu0 %2857 }
0x17ad   :  { %4332 = vrcp.f32 %v2858_v40 }
0x17b0   :  { %v2861_v41 = vpop.xlane.xlu0 %2860 }
0x17b1   :  { %4334 = vrcp.f32 %v2861_v41 }
0x17b4   :  { %v3019_v51 = vpop.permute.xlu0 %3018 }
0x17ba   :  { %v4333_v46 = vpop.eup %4332 }
0x17bb   :  { %v2863_v47 = vmul.f32 %v4333_v46, %v4329_v31 }
0x17bd   :  { %4179 = vmatmul.mubr.msk.f32.vlgmr.msra.gmra.mxu0 %vm181_vm2, %v2863_v47 }
0x17be   :  { %v4335_v48 = vpop.eup %4334  ;;  %4187 = vmatpush3.xpose.msk.msra.mxu0 %vm181_vm2, %v3021_v45  ;;  %4188 = vmatprep.mubr.msk.f32.mxu0 %vm4379_vm1, %v4378_v39 }
0x17bf   :  { %v2865_v50 = vmul.f32 %v4335_v48, %v4331_v33  ;;  %4196 = vmatprep.subr.mxu0 %v4378_v39 }
0x17c1   :  { %4184 = vmatmul.mubr.msk.f32.vlgmr.msra.gmra.mxu1 %vm181_vm2, %v2865_v50  ;;  %4189 = vmatmul.mubr.msk.f32.vlgmr.msra.gmra.mxu0 %vm181_vm2, %v3019_v51 }
0x17c2   :  { %4192 = vmatpush3.xpose.msk.msra.mxu1 %vm181_vm2, %v3099_v49  ;;  %4193 = vmatprep.mubr.msk.f32.mxu1 %vm4379_vm1, %v4378_v39 }
0x17c3   :  { %4201 = vmatprep.subr.mxu1 %v4378_v39  ;;  %4198 = vmatprep.mubr.msk.f32.mxu0 %vm4379_vm1, %v4378_v39 }
0x17c5   :  { %4194 = vmatmul.mubr.msk.f32.vlgmr.msra.gmra.mxu1 %vm181_vm2, %v3097_v52 }
0x17c6   :  { %4203 = vmatprep.mubr.msk.f32.mxu1 %vm4379_vm1, %v4378_v39 }
0x187d   :  { %v2938_v54 = vpop.f32.mrf.mxu0 }
0x187f   :  { %v4180_v27 = vpop.f32.mrf.mxu0 }
0x1881   :  { %v3014_v56 = vpop.f32.mrf.mxu1  ;;  %v3092_v58 = vpop.f32.mrf.mxu0 }
0x1882   :  { %v3174_v59 = vmul.f32 0.35355338, %v3092_v58 }
0x1883   :  { %v4185_v60 = vpop.f32.mrf.mxu1  ;;  %v4190_v61 = vpop.f32.mrf.mxu0 }
0x1884   :  { %v3176_v62 = vadd.f32 %v3174_v59, %v4529_v53 }
0x1885   :  { %v3170_v63 = vpop.f32.mrf.mxu1 }
0x1886   :  { %v3175_v0 = vmul.f32 0.35355338, %v3170_v63  ;;  %v3178_v1 = vsel %vm181_vm2, %v3176_v62, -inf }
0x1887   :  { %3179 = vmax.xlane.f32.xlu0 %v3178_v1  ;;  %v4195_v2 = vpop.f32.mrf.mxu1 }
0x1888   :  { %v3177_v38 = vadd.f32 %v3175_v0, %v4532_v57 }
0x188a   :  { %v3181_v4 = vsel %vm181_vm2, %v3177_v38, -inf }
0x188b   :  { %3182 = vmax.xlane.f32.xlu1 %v3181_v4 }
0x189c   :  { %3276 = vrot.lane.b32.xlu1 %v4799_v23, %s4390_s19 }
0x18a0   :  { %3354 = vrot.lane.b32.xlu1 %v4895_v3, %s4391_s20 }
0x18a4   :  { %3356 = vrot.lane.b32.xlu1 %v4897_v36, %s4391_s20 }
0x18a8   :  { %3364 = vrot.lane.b32.xlu1 %v3014_v56, %s4392_s21 }
0x1910   :  { %v3180_v39 = vpop.xlane.xlu0 %3179 }
0x1911   :  { %v3184_v53 = vsub.f32 %v3176_v62, %v3180_v39 }
0x1913   :  { %v3186_v6 = vmul.f32 1.442695, %v3184_v53  ;;  %v3847_v53 = vld [vmem:[%s5061_s7 + $0x30] sm:$0xff] }
0x1914   :  { %v3183_v8 = vpop.xlane.xlu1 %3182 }
0x1915   :  { %4336 = vpow2.f32 %v3186_v6  ;;  %v3185_v57 = vsub.f32 %v3177_v38, %v3183_v8  ;;  %v3846_v6 = vld [vmem:[%s5061_s7 + $0x28] sm:$0xff]  ;;  %v3845_v8 = vld [vmem:[%s5061_s7 + $0x20] sm:$0xff] }
0x1917   :  { %v3188_v9 = vmul.f32 1.442695, %v3185_v57 }
0x1918   :  { %v3277_v10 = vpop.permute.xlu1 %3276 }
0x1919   :  { %4338 = vpow2.f32 %v3188_v9  ;;  %4202 = vmatpush3.msra.mxu1 %v3277_v10 }
0x191c   :  { %v3355_v32 = vpop.permute.xlu1 %3354 }
0x191d   :  { %v3376_v40 = vsel %vm181_vm2, %v4855_v15, %v3355_v32  ;;  %v4980_v15 = vld [vmem:[%s5060_s6 + $0x8] sm:$0x3f]  ;;  %v3850_v32 = vld [vmem:[%s5062_s8 + $0x1] ss:$0 sm:$0xff]  ;;  %s4394_s8 = smov [#allocation2]  }
0x191e   :  { %v3390_v52 = vrot.slane %v4980_v15, %v4475_v26 }
0x1920   :  { %v3357_v33 = vpop.permute.xlu1 %3356 }
0x1921   :  { %v3377_v48 = vsel %vm181_vm2, %v4857_v17, %v3357_v33 }
0x1922   :  { %v4337_v11 = vpop.eup %4336 }
0x1923   :  { %v3190_v23 = vsel %vm181_vm2, %v4337_v11, 0.0 }
0x1924   :  { %3191 = vadd.xlane.f32.xlu0 %v3190_v23  ;;  %v3365_v41 = vpop.permute.xlu1 %3364 }
0x1925   :  { %v3379_v49 = vsel %vm1551_vm4, %v3377_v48, %v3365_v41 }
0x1926   :  { %v4339_v3 = vpop.eup %4338 }
0x1927   :  { %v3193_v42 = vsel %vm181_vm2, %v4339_v3, 0.0 }
0x1928   :  { %3194 = vadd.xlane.f32.xlu0 %v3193_v42  ;;  %v3503_v42 = vrot.slane %v4980_v15, %v4481_v28  ;;  %v3860_v28 = vld [vmem:[%s5063_s9 + $0x78] sm:$0xff] }
0x193e   :  { %3200 = vrot.lane.b32.xlu0 %v4801_v43, %s4390_s19  ;;  %v3842_v43 = vld [vmem:[%s5059_s5 + $0x38] sm:$0xff] }
0x1942   :  { %3362 = vrot.lane.b32.xlu0 %v2938_v54, %s4392_s21 }
0x19ad   :  { %v3192_v36 = vpop.xlane.xlu0 %3191 }
0x19ae   :  { %4340 = vrcp.f32 %v3192_v36 }
0x19b1   :  { %v3195_v12 = vpop.xlane.xlu0 %3194 }
0x19b2   :  { %4342 = vrcp.f32 %v3195_v12 }
0x19b5   :  { %v3201_v5 = vpop.permute.xlu0 %3200 }
0x19b6   :  { %4197 = vmatpush3.msra.mxu0 %v3201_v5  ;;  %v3509_v5 = vrot.slane %v4980_v15, %v1682_v7  ;;  %v3859_v7 = vld [vmem:[%s5063_s9 + $0x70] sm:$0xff] }
0x19b7   :  { %4206 = vmatprep.subr.mxu0 %v3842_v43 }
0x19b9   :  { %v3363_v37 = vpop.permute.xlu0 %3362 }
0x19ba   :  { %v3378_v45 = vsel %vm1551_vm4, %v3376_v40, %v3363_v37 }
0x19bb   :  { %v4341_v13 = vpop.eup %4340 }
0x19bc   :  { %v3197_v14 = vmul.f32 %v4341_v13, %v4337_v11 }
0x19be   :  { %4199 = vmatmul.mubr.msk.f32.vlgmr.msra.gmra.mxu0 %vm181_vm2, %v3197_v14 }
0x19bf   :  { %v4343_v16 = vpop.eup %4342  ;;  %4207 = vmatpush3.msra.mxu0 %v3842_v43 }
0x19c0   :  { %v3199_v18 = vmul.f32 %v4343_v16, %v4339_v3  ;;  %4208 = vmatprep.subr.mxu0 %v3841_v19 }
0x19c1   :  { %4209 = vmatpush3.msra.mxu0 %v3841_v19 }
0x19c2   :  { %4204 = vmatmul.mubr.msk.f32.vlgmr.msra.gmra.mxu1 %vm181_vm2, %v3199_v18  ;;  %4210 = vmatprep.subr.mxu0 %v3840_v20 }
0x19c3   :  { %4211 = vmatpush3.msra.mxu0 %v3840_v20  ;;  %v3858_v20 = vld [vmem:[%s5063_s9 + $0x68] sm:$0xff] }
0x19c4   :  { %4212 = vmatprep.subr.mxu0 %v3839_v21 }
0x19c5   :  { %4213 = vmatpush3.msra.mxu0 %v3839_v21  ;;  %v3857_v21 = vld [vmem:[%s5063_s9 + $0x60] sm:$0xff] }
0x19c6   :  { %4228 = vmatprep.subr.mxu0 %v3860_v28 }
0x1a7e   :  { %v3272_v24 = vpop.f32.mrf.mxu0 }
0x1a7f   :  { %3370 = vrot.lane.b32.xlu0 %v3272_v24, %s4393_s30  ;;  %v3856_v24 = vld [vmem:[%s5063_s9 + $0x58] sm:$0xff] }
0x1a80   :  { %v4200_v29 = vpop.f32.mrf.mxu0 }
0x1a81   :  { %v3855_v29 = vld [vmem:[%s5063_s9 + $0x50] sm:$0xff] }
0x1a82   :  { %v3348_v30 = vpop.f32.mrf.mxu1 }
0x1a83   :  { %3372 = vrot.lane.b32.xlu1 %v3348_v30, %s4393_s30  ;;  %v3854_v30 = vld [vmem:[%s5063_s9 + $0x48] sm:$0xff] }
0x1a84   :  { %v4205_v31 = vpop.f32.mrf.mxu1 }
0x1a85   :  { %v3853_v31 = vld [vmem:[%s5063_s9 + $0x40] sm:$0xff]  ;;  %s3764_s9 = sshll.u32 %s4394_s8, 4  ;;  %s3765_s9 = int_to_ptr.vmem [resolvable:$true] %s3764_s9 }
0x1a86   :  { %s4356_s5 = scalar_lea.vmem %s3765_s9, 32  ;;  %p4361_p1 = scmp.lt.s32.totalorder %s3765_s9, %s3765_s9 }
0x1a87   :  { %p4357_p0 = scmp.ne.s32.totalorder %s3765_s9, %s4356_s5  ;;  %p4362_p2 = scmp.lt.s32.totalorder %s4356_s5, %s4356_s5 }
0x1a89   :  { %p4363_p3 = por %p4362_p2, %p4361_p1 }
0x1a8b   :  { %p4364_p4 = pnand %p4363_p3, %p4357_p0 }
0x1af1   :  { %v3371_v46 = vpop.permute.xlu0 %3370 }
0x1af2   :  { %v3380_v47 = vsel %vm1554_vm3, %v3378_v45, %v3371_v46 }
0x1af3   :  { %4214 = vmatprep.mubr.msk.f32.mxu0 %vm39_vm0, %v3380_v47 }
0x1af5   :  { %v3373_v50 = vpop.permute.xlu1 %3372 }
0x1af6   :  { %v3381_v51 = vsel %vm1554_vm3, %v3379_v49, %v3373_v50 }
0x1af7   :  { %4215 = vmatmul.mubr.msk.f32.vlgmr.msra.gmra.mxu0 %vm39_vm0, %v3381_v51 }
0x1af8   :  { %4229 = vmatpush3.msra.mxu0 %v3860_v28 }
0x1af9   :  { %4230 = vmatprep.subr.mxu0 %v3859_v7 }
0x1afa   :  { %4231 = vmatpush3.msra.mxu0 %v3859_v7 }
0x1afb   :  { %4232 = vmatprep.subr.mxu0 %v3858_v20 }
0x1afc   :  { %4233 = vmatpush3.msra.mxu0 %v3858_v20 }
0x1afd   :  { %4234 = vmatprep.subr.mxu0 %v3857_v21 }
0x1afe   :  { %4235 = vmatpush3.msra.mxu0 %v3857_v21 }
0x1aff   :  { %4236 = vmatprep.subr.mxu0 %v3856_v24 }
0x1b00   :  { %4237 = vmatpush3.msra.mxu0 %v3856_v24 }
0x1b01   :  { %4238 = vmatprep.subr.mxu0 %v3855_v29 }
0x1b02   :  { %4239 = vmatpush3.msra.mxu0 %v3855_v29 }
0x1b03   :  { %4240 = vmatprep.subr.mxu0 %v3854_v30 }
0x1b04   :  { %4241 = vmatpush3.msra.mxu0 %v3854_v30 }
0x1b05   :  { %4242 = vmatprep.subr.mxu0 %v3853_v31 }
0x1b06   :  { %4243 = vmatpush3.msra.mxu0 %v3853_v31 }
0x1bb7   :  { %v4216_v54 = vpop.f32.mrf.mxu0 }
0x1bb8   :  { %v3469_v27 = vadd.f32 %v4216_v54, %v3390_v52 }
0x1bb9   :  { %v3463_v56 = vpop.f32.mrf.mxu0 }
0x1bba   :  { %v3473_v17 = vadd.f32 %v3469_v27, %v4788_v35  ;;  %v3464_v58 = vadd.f32 %v3463_v56, %v3390_v52  ;;  %v3628_v56 = vrot.slane %v4980_v15, %v1798_v55 }
0x1bbc   :  { %v3472_v59 = vadd.f32 %v3464_v58, %v4786_v34  ;;  %v3477_v60 = vsel %vm39_vm0, %v3473_v17, 0.0  ;;  %v3848_v34 = vld [vmem:[%s5061_s7 + $0x38] sm:$0xff] }
0x1bbd   :  { %3478 = vadd.xlane.f32.xlu1 %v3477_v60  ;;  %4217 = vmatprep.subr.mxu1 %v3848_v34 }
0x1bbe   :  { %v3474_v61 = vsel %vm39_vm0, %v3472_v59, 0.0  ;;  %4218 = vmatpush3.msra.mxu1 %v3848_v34 }
0x1bbf   :  { %3475 = vadd.xlane.f32.xlu0 %v3474_v61  ;;  %4219 = vmatprep.subr.mxu1 %v3847_v53 }
0x1bc0   :  { %4220 = vmatpush3.msra.mxu1 %v3847_v53 }
0x1bc1   :  { %4221 = vmatprep.subr.mxu1 %v3846_v6 }
0x1bc2   :  { %4222 = vmatpush3.msra.mxu1 %v3846_v6 }
0x1bc3   :  { %4223 = vmatprep.subr.mxu1 %v3845_v8 }
0x1bc4   :  { %4224 = vmatpush3.msra.mxu1 %v3845_v8 }
0x1c46   :  { %v3479_v62 = vpop.xlane.xlu1 %3478 }
0x1c47   :  { %v3481_v63 = vmul.f32 0.03125, %v3479_v62 }
0x1c48   :  { %v3476_v0 = vpop.xlane.xlu0 %3475 }
0x1c49   :  { %v3480_v1 = vmul.f32 0.03125, %v3476_v0  ;;  %v3483_v2 = vsub.f32 %v3473_v17, %v3481_v63 }
0x1c4b   :  { %v3482_v26 = vsub.f32 %v3472_v59, %v3480_v1  ;;  %v3485_v39 = vmul.f32 %v3483_v2, %v3483_v2 }
0x1c4d   :  { %v3484_v38 = vmul.f32 %v3482_v26, %v3482_v26  ;;  %v3489_v35 = vsel %vm39_vm0, %v3485_v39, 0.0 }
0x1c4f   :  { %v3486_v4 = vsel %vm39_vm0, %v3484_v38, 0.0 }
0x1c50   :  { %3487 = vadd.xlane.f32.xlu0 %v3486_v4 }
0x1c54   :  { %3490 = vadd.xlane.f32.xlu0 %v3489_v35 }
0x1cd9   :  { %v3488_v57 = vpop.xlane.xlu0 %3487 }
0x1cda   :  { %v3492_v9 = vmul.f32 0.03125, %v3488_v57 }
0x1cdc   :  { %v3494_v10 = vadd.f32 1e-05, %v3492_v9 }
0x1cdd   :  { %v3491_v11 = vpop.xlane.xlu0 %3490 }
0x1cde   :  { %4344 = vrsqrt.f32 %v3494_v10  ;;  %v3493_v23 = vmul.f32 0.03125, %v3491_v11 }
0x1ce0   :  { %v3495_v3 = vadd.f32 1e-05, %v3493_v23  ;;  %v3741_v23 = vrot.slane %v4980_v15, %v1912_v44 }
0x1ce2   :  { %4346 = vrsqrt.f32 %v3495_v3 }
0x1ceb   :  { %v4345_v36 = vpop.eup %4344 }
0x1cec   :  { %v3498_v12 = vmul.f32 %v4345_v36, %v3482_v26  ;;  %v3747_v36 = vrot.slane %v4980_v15, %v1918_v22 }
0x1cee   :  { %v3504_v13 = vmul.f32 %v3503_v42, %v3498_v12 }
0x1cef   :  { %v4347_v14 = vpop.eup %4346 }
0x1cf0   :  { %v3499_v16 = vmul.f32 %v4347_v14, %v3483_v2  ;;  %v3510_v18 = vadd.f32 %v3509_v5, %v3504_v13 }
0x1cf2   :  { %v3505_v43 = vmul.f32 %v3503_v42, %v3499_v16  ;;  %4225 = vmatprep.mubr.msk.f32.mxu1 %vm39_vm0, %v3510_v18 }
0x1cf4   :  { %v3511_v19 = vadd.f32 %v3509_v5, %v3505_v43 }
0x1cf6   :  { %4226 = vmatmul.mubr.msk.f32.vlgmr.msra.gmra.mxu1 %vm39_vm0, %v3511_v19 }
0x1db6   :  { %v4227_v33 = vpop.f32.mrf.mxu1 }
0x1db7   :  { %v3603_v37 = vadd.f32 %v4227_v33, %v3850_v32 }
0x1db8   :  { %v3597_v40 = vpop.f32.mrf.mxu1 }
0x1db9   :  { %v3609_v41 = vmul.f32 0.70710677, %v3603_v37  ;;  %v3598_v45 = vadd.f32 %v3850_v32, %v3597_v40  ;;  %v3607_v52 = vmul.f32 0.5, %v3603_v37 }
0x1dbb   :  { %4348 = verf.f32 %v3609_v41  ;;  %v3608_v46 = vmul.f32 0.70710677, %v3598_v45  ;;  %v3606_v50 = vmul.f32 0.5, %v3598_v45 }
0x1dbd   :  { %4350 = verf.f32 %v3608_v46 }
0x1dc8   :  { %v4349_v47 = vpop.eup %4348 }
0x1dc9   :  { %v3613_v49 = vadd.f32 1.0, %v4349_v47 }
0x1dca   :  { %v4351_v48 = vpop.eup %4350 }
0x1dcb   :  { %v3612_v51 = vadd.f32 1.0, %v4351_v48  ;;  %v3615_v27 = vmul.f32 %v3613_v49, %v3607_v52 }
0x1dcd   :  { %v3614_v54 = vmul.f32 %v3612_v51, %v3606_v50 }
0x1dcf   :  { %4244 = vmatprep.mubr.msk.f32.mxu0 %vm1800_vm5, %v3614_v54 }
0x1dd0   :  { %4245 = vmatmul.mubr.msk.f32.vlgmr.msra.gmra.mxu0 %vm1800_vm5, %v3615_v27 }
0x1e90   :  { %v4246_v17 = vpop.f32.mrf.mxu0 }
0x1e91   :  { %v3707_v58 = vadd.f32 %v4246_v17, %v3628_v56 }
0x1e92   :  { %v3701_v59 = vpop.f32.mrf.mxu0 }
0x1e93   :  { %v3711_v60 = vadd.f32 %v3707_v58, %v3511_v19  ;;  %v3702_v61 = vadd.f32 %v3701_v59, %v3628_v56 }
0x1e95   :  { %v3710_v62 = vadd.f32 %v3702_v61, %v3510_v18  ;;  %v3715_v63 = vsel %vm39_vm0, %v3711_v60, 0.0 }
0x1e96   :  { %3716 = vadd.xlane.f32.xlu0 %v3715_v63 }
0x1e97   :  { %v3712_v0 = vsel %vm39_vm0, %v3710_v62, 0.0 }
0x1e98   :  { %3713 = vadd.xlane.f32.xlu1 %v3712_v0 }
0x1f1f   :  { %v3717_v1 = vpop.xlane.xlu0 %3716 }
0x1f20   :  { %v3719_v2 = vmul.f32 0.03125, %v3717_v1 }
0x1f21   :  { %v3714_v26 = vpop.xlane.xlu1 %3713 }
0x1f22   :  { %v3721_v38 = vsub.f32 %v3711_v60, %v3719_v2  ;;  %v3718_v4 = vmul.f32 0.03125, %v3714_v26 }
0x1f24   :  { %v3720_v39 = vsub.f32 %v3710_v62, %v3718_v4  ;;  %v3723_v35 = vmul.f32 %v3721_v38, %v3721_v38 }
0x1f26   :  { %v3727_v55 = vsel %vm39_vm0, %v3723_v35, 0.0  ;;  %v3722_v34 = vmul.f32 %v3720_v39, %v3720_v39 }
0x1f27   :  { %3728 = vadd.xlane.f32.xlu0 %v3727_v55 }
0x1f28   :  { %v3724_v53 = vsel %vm39_vm0, %v3722_v34, 0.0 }
0x1f29   :  { %3725 = vadd.xlane.f32.xlu1 %v3724_v53 }
0x1fb0   :  { %v3729_v6 = vpop.xlane.xlu0 %3728 }
0x1fb1   :  { %v3731_v8 = vmul.f32 0.03125, %v3729_v6 }
0x1fb2   :  { %v3726_v57 = vpop.xlane.xlu1 %3725 }
0x1fb3   :  { %v3733_v9 = vadd.f32 1e-05, %v3731_v8  ;;  %v3730_v10 = vmul.f32 0.03125, %v3726_v57 }
0x1fb5   :  { %4352 = vrsqrt.f32 %v3733_v9  ;;  %v3732_v11 = vadd.f32 1e-05, %v3730_v10 }
0x1fb7   :  { %4354 = vrsqrt.f32 %v3732_v11 }
0x1fc2   :  { %v4353_v3 = vpop.eup %4352 }
0x1fc3   :  { %v3737_v42 = vmul.f32 %v4353_v3, %v3721_v38 }
0x1fc4   :  { %v4355_v12 = vpop.eup %4354 }
0x1fc5   :  { %v3736_v5 = vmul.f32 %v4355_v12, %v3720_v39  ;;  %v3743_v13 = vmul.f32 %v3741_v23, %v3737_v42 }
0x1fc7   :  { %v3742_v14 = vmul.f32 %v3741_v23, %v3736_v5  ;;  %v3749_v16 = vadd.f32 %v3747_v36, %v3743_v13 }
0x1fc9   :  { %v3748_v18 = vadd.f32 %v3747_v36, %v3742_v14  ;;  %v3752_v43 = vrot.slane %v3749_v16, 7 }
0x1fcb   :  { %v3754_v19 = vsel %vm3753_vm6, %v3752_v43, %v3748_v18 }
0x1fcc   :  { %3757 = vst.msk [vmem:[#allocation2] sm:$0x3] %vm3756_vm7, %v3754_v19 }
0x1fcd   :  { %4367 = shalt.err (!%p4364_p4)
}
0x1fce   :  { %3767 = dma.vmem_to_hbm [thread:$0]  %s3765_s9, 32, %s5064_s10, [#allocation3]  }
0x1fcf   :  { %4376 = dma.done.wait [#allocation3], 32  }
0x1fd0   :  { %4377 = vsyncadd [#allocation3], 4294967264 }
0x1fd1   :  { %3771 = vsyncpa [#allocation3], 1 }

</bundles_post_ra>
